<compile_context>
chip_gen: v7x
topology: tpu7x:2x2x1
jax: 0.10.0
libtpu: 0.0.40
codegen_flags: <defaults>
</compile_context>

<pallas_src>
import math

import jax
import jax.numpy as jnp
from jax import lax
from jax.experimental import pallas as pl
from jax.experimental.pallas import tpu as pltpu


def _round_up(x, m):
    return ((x + m - 1) // m) * m


def _pick_q_tile(lq, max_tq=256):
    """Largest query tile <= max_tq that evenly divides Lq (multiple of 8 when tiling)."""
    if lq <= max_tq:
        return lq
    for t in range(max_tq, 7, -1):
        if lq % t == 0 and t % 8 == 0:
            return t
    return lq  # fallback: single (large) tile


def make_cross_attention_kernel(n_heads, d_head, d_embed, tq, lkv, lkv_pad,
                                compute_dtype):
    scale = 1.0 / math.sqrt(d_head)
    masked = lkv_pad != lkv

    def kernel(x_ref, y_ref, wq_ref, bq_ref, wk_ref, bk_ref, wv_ref, bv_ref,
               wo_ref, bo_ref, o_ref, k_sc, v_sc):
        qi = pl.program_id(1)

        # K/V projections once per batch element; cached per-head in VMEM scratch
        # and reused for every query tile of this batch element.
        @pl.when(qi == 0)
        def _():
            yb = y_ref[0].astype(compute_dtype)            # (Lkv_pad, d_cross)
            for h in range(n_heads):
                kh = jnp.dot(yb, wk_ref[h],
                             preferred_element_type=jnp.float32) + bk_ref[h]
                vh = jnp.dot(yb, wv_ref[h],
                             preferred_element_type=jnp.float32) + bv_ref[h]
                k_sc[h] = kh.astype(compute_dtype)
                v_sc[h] = vh.astype(compute_dtype)

        xb = x_ref[0].astype(compute_dtype)                # (TQ, d_embed)

        if masked:
            # Hoisted out of the head loop (JAX does not CSE broadcasts).
            col_ok = lax.broadcasted_iota(jnp.int32, (tq, lkv_pad), 1) < lkv

        acc = jnp.zeros((tq, d_embed), jnp.float32)        # fused-out-proj accumulator
        for h in range(n_heads):
            # Q projection for this head (static weight-ref slice: free).
            qh = jnp.dot(xb, wq_ref[h],
                         preferred_element_type=jnp.float32) + bq_ref[h]
            qh = (qh * scale).astype(compute_dtype)        # (TQ, d_head)

            # Scores: contract last dims directly -> no XLU transpose of K.
            s = lax.dot_general(qh, k_sc[h], (((1,), (1,)), ((), ())),
                                preferred_element_type=jnp.float32)  # (TQ, Lkv_pad)
            if masked:
                s = jnp.where(col_ok, s, jnp.float32(-1e30))

            s = s - jnp.max(s, axis=-1, keepdims=True)
            p = jnp.exp(s)
            p = p * pl.reciprocal(jnp.sum(p, axis=-1, keepdims=True), approx=True)

            ctx_h = jnp.dot(p.astype(compute_dtype), v_sc[h],
                            preferred_element_type=jnp.float32)      # (TQ, d_head)

            # Fused output projection: lane-dense accumulation, no concat.
            acc = acc + jnp.dot(ctx_h.astype(compute_dtype), wo_ref[h],
                                preferred_element_type=jnp.float32)  # (TQ, d_embed)

        o_ref[0] = (acc + bo_ref[...]).astype(o_ref.dtype)

    return kernel


def prepare_params(params, n_heads, compute_dtype=jnp.bfloat16):
    """One-time weight preprocessing (hoist out of the per-call path)."""
    d_embed = params["wq"].shape[0]
    d_cross = params["wk"].shape[1]
    d_head = d_embed // n_heads

    def split_in_out(w_pt, d_in):   # PyTorch (out, in) -> (n_heads, in, d_head)
        return (w_pt.T.reshape(d_in, n_heads, d_head)
                .transpose(1, 0, 2).astype(compute_dtype))

    return {
        "wq": split_in_out(params["wq"], d_embed),
        "wk": split_in_out(params["wk"], d_cross),
        "wv": split_in_out(params["wv"], d_cross),
        "wo": params["wo"].T.reshape(n_heads, d_head, d_embed).astype(compute_dtype),
        "bq": params["bq"].reshape(n_heads, 1, d_head).astype(jnp.float32),
        "bk": params["bk"].reshape(n_heads, 1, d_head).astype(jnp.float32),
        "bv": params["bv"].reshape(n_heads, 1, d_head).astype(jnp.float32),
        "bo": params["bo"].reshape(1, d_embed).astype(jnp.float32),
    }


def cross_attention(x, y, prepped, n_heads, *, max_q_tile=256,
                    compute_dtype=jnp.bfloat16, vmem_limit_bytes=None):
    """x: (B, Lq, d_embed), y: (B, Lkv, d_cross); prepped from prepare_params()."""
    B, Lq, d_embed = x.shape
    _, Lkv, d_cross = y.shape
    d_head = d_embed // n_heads

    tq = _pick_q_tile(Lq, max_q_tile)
    n_q_tiles = Lq // tq

    # Pad Lkv to a lane-dense multiple of 128; padded columns are masked in-kernel.
    lkv_pad = _round_up(Lkv, 128)
    if lkv_pad != Lkv:
        y = jnp.pad(y, ((0, 0), (0, lkv_pad - Lkv), (0, 0)))

    kernel = make_cross_attention_kernel(n_heads, d_head, d_embed, tq, Lkv,
                                         lkv_pad, compute_dtype)

    def full(shape):  # whole-array block, resident across all grid steps
        nd = len(shape)
        return pl.BlockSpec(shape, lambda b, qi, _nd=nd: (0,) * _nd)

    grid_spec = pltpu.PrefetchScalarGridSpec(
        num_scalar_prefetch=0,
        grid=(B, n_q_tiles),
        in_specs=[
            pl.BlockSpec((1, tq, d_embed), lambda b, qi: (b, qi, 0)),      # x
            pl.BlockSpec((1, lkv_pad, d_cross), lambda b, qi: (b, 0, 0)),  # y
            full((n_heads, d_embed, d_head)),                              # wq
            full((n_heads, 1, d_head)),                                    # bq
            full((n_heads, d_cross, d_head)),                              # wk
            full((n_heads, 1, d_head)),                                    # bk
            full((n_heads, d_cross, d_head)),                              # wv
            full((n_heads, 1, d_head)),                                    # bv
            full((n_heads, d_head, d_embed)),                              # wo
            full((1, d_embed)),                                            # bo
        ],
        out_specs=pl.BlockSpec((1, tq, d_embed), lambda b, qi: (b, qi, 0)),
        scratch_shapes=[
            pltpu.VMEM((n_heads, lkv_pad, d_head), compute_dtype),  # K cache
            pltpu.VMEM((n_heads, lkv_pad, d_head), compute_dtype),  # V cache
        ],
    )

    # Batch axis is "parallel" (megacore shards it); the q-tile axis must stay
    # "arbitrary" so the per-batch K/V scratch cache (pl.when(qi == 0)) is valid.
    compiler_params = pltpu.CompilerParams(
        dimension_semantics=("parallel", "arbitrary"),
        vmem_limit_bytes=vmem_limit_bytes,
    )

    return pl.pallas_call(
        kernel,
        out_shape=jax.ShapeDtypeStruct((B, Lq, d_embed), x.dtype),
        grid_spec=grid_spec,
        compiler_params=compiler_params,
    )(x, y, prepped["wq"], prepped["bq"], prepped["wk"], prepped["bk"],
      prepped["wv"], prepped["bv"], prepped["wo"], prepped["bo"])


def cross_attention_ref(x, y, params, n_heads):
    """Pure-JAX reference matching the PyTorch forward exactly (f32)."""
    B, Lq, d_embed = x.shape
    d_head = d_embed // n_heads
    q = x @ params["wq"].T + params["bq"]
    k = y @ params["wk"].T + params["bk"]
    v = y @ params["wv"].T + params["bv"]
    q = q.reshape(B, -1, n_heads, d_head).transpose(0, 2, 1, 3)
    k = k.reshape(B, -1, n_heads, d_head).transpose(0, 2, 1, 3)
    v = v.reshape(B, -1, n_heads, d_head).transpose(0, 2, 1, 3)
    w = jnp.einsum("bhqd,bhkd->bhqk", q, k) / math.sqrt(d_head)
    w = jax.nn.softmax(w, axis=-1)
    o = jnp.einsum("bhqk,bhkd->bhqd", w, v)
    o = o.transpose(0, 2, 1, 3).reshape(B, Lq, d_embed)
    return o @ params["wo"].T + params["bo"]


if __name__ == "__main__":
    # Small shapes consistent with the module.
    B, Lq, Lkv = 2, 8, 8
    n_heads, d_embed, d_cross = 4, 32, 24

    key = jax.random.PRNGKey(0)
    keys = jax.random.split(key, 10)

    params = {
        "wq": jax.random.normal(keys[0], (d_embed, d_embed), jnp.float32) * 0.1,
        "bq": jax.random.normal(keys[1], (d_embed,), jnp.float32) * 0.1,
        "wk": jax.random.normal(keys[2], (d_embed, d_cross), jnp.float32) * 0.1,
        "bk": jax.random.normal(keys[3], (d_embed,), jnp.float32) * 0.1,
        "wv": jax.random.normal(keys[4], (d_embed, d_cross), jnp.float32) * 0.1,
        "bv": jax.random.normal(keys[5], (d_embed,), jnp.float32) * 0.1,
        "wo": jax.random.normal(keys[6], (d_embed, d_embed), jnp.float32) * 0.1,
        "bo": jax.random.normal(keys[7], (d_embed,), jnp.float32) * 0.1,
    }
    x = jax.random.normal(keys[8], (B, Lq, d_embed), jnp.float32)
    y = jax.random.normal(keys[9], (B, Lkv, d_cross), jnp.float32)

    # One-time weight preprocessing (reused across calls / diffusion steps).
    prepped = prepare_params(params, n_heads)

    out = cross_attention(x, y, prepped, n_heads)
    out = jax.block_until_ready(out)

    ref = cross_attention_ref(x, y, params, n_heads)
    assert out.shape == (B, Lq, d_embed)
    # bf16 MXU operands + approx reciprocal -> slightly looser tolerance vs f32 ref.
    max_err = float(jnp.max(jnp.abs(out - ref)))
    assert max_err < 2e-2, f"max abs err {max_err}"

    print("KERNEL_OK")
</pallas_src>

<mosaic_0001>
module attributes {stable_mosaic.version = 11 : i64} {
  func.func @kernel(%arg0: i32, %arg1: i32, %arg2: memref<1x8x32xf32, #tpu.memory_space<vmem>>, %arg3: memref<1x128x24xf32, #tpu.memory_space<vmem>>, %arg4: memref<4x32x8xbf16, #tpu.memory_space<vmem>>, %arg5: memref<4x1x8xf32, #tpu.memory_space<vmem>>, %arg6: memref<4x24x8xbf16, #tpu.memory_space<vmem>>, %arg7: memref<4x1x8xf32, #tpu.memory_space<vmem>>, %arg8: memref<4x24x8xbf16, #tpu.memory_space<vmem>>, %arg9: memref<4x1x8xf32, #tpu.memory_space<vmem>>, %arg10: memref<4x8x32xbf16, #tpu.memory_space<vmem>>, %arg11: memref<1x32xf32, #tpu.memory_space<vmem>>, %arg12: memref<1x8x32xf32, #tpu.memory_space<vmem>>, %arg13: memref<4x128x8xbf16, #tpu.memory_space<vmem>>, %arg14: memref<4x128x8xbf16, #tpu.memory_space<vmem>>) attributes {dimension_semantics = [#tpu.dimension_semantics<parallel>, #tpu.dimension_semantics<arbitrary>], iteration_bounds = array<i64: 2, 1>, scalar_prefetch = 0 : i64, scratch_operands = 2 : i64, tpu.core_type = #tpu.core_type<tc>, window_params = [{transform_indices = @transform_0, window_bounds = array<i64: 1, 8, 32>}, {transform_indices = @transform_1, window_bounds = array<i64: 1, 128, 24>}, {pipeline_mode = #tpu.pipeline_mode<synchronous>, transform_indices = @transform_2, window_bounds = array<i64: 4, 32, 8>}, {pipeline_mode = #tpu.pipeline_mode<synchronous>, transform_indices = @transform_3, window_bounds = array<i64: 4, 1, 8>}, {pipeline_mode = #tpu.pipeline_mode<synchronous>, transform_indices = @transform_4, window_bounds = array<i64: 4, 24, 8>}, {pipeline_mode = #tpu.pipeline_mode<synchronous>, transform_indices = @transform_5, window_bounds = array<i64: 4, 1, 8>}, {pipeline_mode = #tpu.pipeline_mode<synchronous>, transform_indices = @transform_6, window_bounds = array<i64: 4, 24, 8>}, {pipeline_mode = #tpu.pipeline_mode<synchronous>, transform_indices = @transform_7, window_bounds = array<i64: 4, 1, 8>}, {pipeline_mode = #tpu.pipeline_mode<synchronous>, transform_indices = @transform_8, window_bounds = array<i64: 4, 8, 32>}, {pipeline_mode = #tpu.pipeline_mode<synchronous>, transform_indices = @transform_9, window_bounds = array<i64: 1, 32>}, {transform_indices = @transform_10, window_bounds = array<i64: 1, 8, 32>}]} {
    %c0_i32 = arith.constant 0 : i32
    %0 = arith.cmpi eq, %arg1, %c0_i32 : i32
    %1 = arith.extui %0 : i1 to i32
    %c0_i32_0 = arith.constant 0 : i32
    %2 = arith.cmpi ne, %1, %c0_i32_0 : i32
    scf.if %2 {
      %c0_97 = arith.constant 0 : index
      %c0_98 = arith.constant 0 : index
      %c0_99 = arith.constant 0 : index
      %152 = vector.load %arg3[%c0_97, %c0_98, %c0_99] : memref<1x128x24xf32, #tpu.memory_space<vmem>>, vector<1x128x24xf32>
      %153 = vector.shape_cast %152 : vector<1x128x24xf32> to vector<128x24xf32>
      %154 = arith.truncf %153 : vector<128x24xf32> to vector<128x24xbf16>
      %c0_100 = arith.constant 0 : index
      %c0_101 = arith.constant 0 : index
      %c0_102 = arith.constant 0 : index
      %155 = vector.load %arg6[%c0_100, %c0_101, %c0_102] : memref<4x24x8xbf16, #tpu.memory_space<vmem>>, vector<1x24x8xbf16>
      %156 = vector.shape_cast %155 : vector<1x24x8xbf16> to vector<24x8xbf16>
      %cst_103 = arith.constant dense<0.000000e+00> : vector<128x8xf32>
      %157 = tpu.matmul %154, %156, %cst_103 {dimension_numbers = #tpu.dot_dimension_numbers<[1], [0], [0], [1], [0, 0, 1, 1], [], []>} : vector<128x24xbf16>, vector<24x8xbf16>, vector<128x8xf32> -> vector<128x8xf32>
      %c0_104 = arith.constant 0 : index
      %c0_105 = arith.constant 0 : index
      %c0_106 = arith.constant 0 : index
      %158 = vector.load %arg7[%c0_104, %c0_105, %c0_106] : memref<4x1x8xf32, #tpu.memory_space<vmem>>, vector<1x1x8xf32>
      %159 = vector.shape_cast %158 : vector<1x1x8xf32> to vector<1x8xf32>
      %160 = vector.broadcast %159 : vector<1x8xf32> to vector<128x8xf32>
      %161 = arith.addf %157, %160 : vector<128x8xf32>
      %c0_107 = arith.constant 0 : index
      %c0_108 = arith.constant 0 : index
      %c0_109 = arith.constant 0 : index
      %162 = vector.load %arg8[%c0_107, %c0_108, %c0_109] : memref<4x24x8xbf16, #tpu.memory_space<vmem>>, vector<1x24x8xbf16>
      %163 = vector.shape_cast %162 : vector<1x24x8xbf16> to vector<24x8xbf16>
      %cst_110 = arith.constant dense<0.000000e+00> : vector<128x8xf32>
      %164 = tpu.matmul %154, %163, %cst_110 {dimension_numbers = #tpu.dot_dimension_numbers<[1], [0], [0], [1], [0, 0, 1, 1], [], []>} : vector<128x24xbf16>, vector<24x8xbf16>, vector<128x8xf32> -> vector<128x8xf32>
      %c0_111 = arith.constant 0 : index
      %c0_112 = arith.constant 0 : index
      %c0_113 = arith.constant 0 : index
      %165 = vector.load %arg9[%c0_111, %c0_112, %c0_113] : memref<4x1x8xf32, #tpu.memory_space<vmem>>, vector<1x1x8xf32>
      %166 = vector.shape_cast %165 : vector<1x1x8xf32> to vector<1x8xf32>
      %167 = vector.broadcast %166 : vector<1x8xf32> to vector<128x8xf32>
      %168 = arith.addf %164, %167 : vector<128x8xf32>
      %169 = arith.truncf %161 : vector<128x8xf32> to vector<128x8xbf16>
      %c0_114 = arith.constant 0 : index
      %c0_115 = arith.constant 0 : index
      %c0_116 = arith.constant 0 : index
      %170 = vector.load %arg13[%c0_114, %c0_115, %c0_116] : memref<4x128x8xbf16, #tpu.memory_space<vmem>>, vector<1x128x8xbf16>
      %171 = vector.shape_cast %170 : vector<1x128x8xbf16> to vector<128x8xbf16>
      %172 = vector.shape_cast %169 : vector<128x8xbf16> to vector<1x128x8xbf16>
      tpu.vector_store %arg13[%c0_114, %c0_115, %c0_116], %172 {strides = array<i32>} : memref<4x128x8xbf16, #tpu.memory_space<vmem>>, vector<1x128x8xbf16>,
      %173 = arith.truncf %168 : vector<128x8xf32> to vector<128x8xbf16>
      %c0_117 = arith.constant 0 : index
      %c0_118 = arith.constant 0 : index
      %c0_119 = arith.constant 0 : index
      %174 = vector.load %arg14[%c0_117, %c0_118, %c0_119] : memref<4x128x8xbf16, #tpu.memory_space<vmem>>, vector<1x128x8xbf16>
      %175 = vector.shape_cast %174 : vector<1x128x8xbf16> to vector<128x8xbf16>
      %176 = vector.shape_cast %173 : vector<128x8xbf16> to vector<1x128x8xbf16>
      tpu.vector_store %arg14[%c0_117, %c0_118, %c0_119], %176 {strides = array<i32>} : memref<4x128x8xbf16, #tpu.memory_space<vmem>>, vector<1x128x8xbf16>,
      %c1_120 = arith.constant 1 : index
      %c0_121 = arith.constant 0 : index
      %c0_122 = arith.constant 0 : index
      %177 = vector.load %arg6[%c1_120, %c0_121, %c0_122] : memref<4x24x8xbf16, #tpu.memory_space<vmem>>, vector<1x24x8xbf16>
      %178 = vector.shape_cast %177 : vector<1x24x8xbf16> to vector<24x8xbf16>
      %cst_123 = arith.constant dense<0.000000e+00> : vector<128x8xf32>
      %179 = tpu.matmul %154, %178, %cst_123 {dimension_numbers = #tpu.dot_dimension_numbers<[1], [0], [0], [1], [0, 0, 1, 1], [], []>} : vector<128x24xbf16>, vector<24x8xbf16>, vector<128x8xf32> -> vector<128x8xf32>
      %c1_124 = arith.constant 1 : index
      %c0_125 = arith.constant 0 : index
      %c0_126 = arith.constant 0 : index
      %180 = vector.load %arg7[%c1_124, %c0_125, %c0_126] : memref<4x1x8xf32, #tpu.memory_space<vmem>>, vector<1x1x8xf32>
      %181 = vector.shape_cast %180 : vector<1x1x8xf32> to vector<1x8xf32>
      %182 = vector.broadcast %181 : vector<1x8xf32> to vector<128x8xf32>
      %183 = arith.addf %179, %182 : vector<128x8xf32>
      %c1_127 = arith.constant 1 : index
      %c0_128 = arith.constant 0 : index
      %c0_129 = arith.constant 0 : index
      %184 = vector.load %arg8[%c1_127, %c0_128, %c0_129] : memref<4x24x8xbf16, #tpu.memory_space<vmem>>, vector<1x24x8xbf16>
      %185 = vector.shape_cast %184 : vector<1x24x8xbf16> to vector<24x8xbf16>
      %cst_130 = arith.constant dense<0.000000e+00> : vector<128x8xf32>
      %186 = tpu.matmul %154, %185, %cst_130 {dimension_numbers = #tpu.dot_dimension_numbers<[1], [0], [0], [1], [0, 0, 1, 1], [], []>} : vector<128x24xbf16>, vector<24x8xbf16>, vector<128x8xf32> -> vector<128x8xf32>
      %c1_131 = arith.constant 1 : index
      %c0_132 = arith.constant 0 : index
      %c0_133 = arith.constant 0 : index
      %187 = vector.load %arg9[%c1_131, %c0_132, %c0_133] : memref<4x1x8xf32, #tpu.memory_space<vmem>>, vector<1x1x8xf32>
      %188 = vector.shape_cast %187 : vector<1x1x8xf32> to vector<1x8xf32>
      %189 = vector.broadcast %188 : vector<1x8xf32> to vector<128x8xf32>
      %190 = arith.addf %186, %189 : vector<128x8xf32>
      %191 = arith.truncf %183 : vector<128x8xf32> to vector<128x8xbf16>
      %c1_134 = arith.constant 1 : index
      %c0_135 = arith.constant 0 : index
      %c0_136 = arith.constant 0 : index
      %192 = vector.load %arg13[%c1_134, %c0_135, %c0_136] : memref<4x128x8xbf16, #tpu.memory_space<vmem>>, vector<1x128x8xbf16>
      %193 = vector.shape_cast %192 : vector<1x128x8xbf16> to vector<128x8xbf16>
      %194 = vector.shape_cast %191 : vector<128x8xbf16> to vector<1x128x8xbf16>
      tpu.vector_store %arg13[%c1_134, %c0_135, %c0_136], %194 {strides = array<i32>} : memref<4x128x8xbf16, #tpu.memory_space<vmem>>, vector<1x128x8xbf16>,
      %195 = arith.truncf %190 : vector<128x8xf32> to vector<128x8xbf16>
      %c1_137 = arith.constant 1 : index
      %c0_138 = arith.constant 0 : index
      %c0_139 = arith.constant 0 : index
      %196 = vector.load %arg14[%c1_137, %c0_138, %c0_139] : memref<4x128x8xbf16, #tpu.memory_space<vmem>>, vector<1x128x8xbf16>
      %197 = vector.shape_cast %196 : vector<1x128x8xbf16> to vector<128x8xbf16>
      %198 = vector.shape_cast %195 : vector<128x8xbf16> to vector<1x128x8xbf16>
      tpu.vector_store %arg14[%c1_137, %c0_138, %c0_139], %198 {strides = array<i32>} : memref<4x128x8xbf16, #tpu.memory_space<vmem>>, vector<1x128x8xbf16>,
      %c2_140 = arith.constant 2 : index
      %c0_141 = arith.constant 0 : index
      %c0_142 = arith.constant 0 : index
      %199 = vector.load %arg6[%c2_140, %c0_141, %c0_142] : memref<4x24x8xbf16, #tpu.memory_space<vmem>>, vector<1x24x8xbf16>
      %200 = vector.shape_cast %199 : vector<1x24x8xbf16> to vector<24x8xbf16>
      %cst_143 = arith.constant dense<0.000000e+00> : vector<128x8xf32>
      %201 = tpu.matmul %154, %200, %cst_143 {dimension_numbers = #tpu.dot_dimension_numbers<[1], [0], [0], [1], [0, 0, 1, 1], [], []>} : vector<128x24xbf16>, vector<24x8xbf16>, vector<128x8xf32> -> vector<128x8xf32>
      %c2_144 = arith.constant 2 : index
      %c0_145 = arith.constant 0 : index
      %c0_146 = arith.constant 0 : index
      %202 = vector.load %arg7[%c2_144, %c0_145, %c0_146] : memref<4x1x8xf32, #tpu.memory_space<vmem>>, vector<1x1x8xf32>
      %203 = vector.shape_cast %202 : vector<1x1x8xf32> to vector<1x8xf32>
      %204 = vector.broadcast %203 : vector<1x8xf32> to vector<128x8xf32>
      %205 = arith.addf %201, %204 : vector<128x8xf32>
      %c2_147 = arith.constant 2 : index
      %c0_148 = arith.constant 0 : index
      %c0_149 = arith.constant 0 : index
      %206 = vector.load %arg8[%c2_147, %c0_148, %c0_149] : memref<4x24x8xbf16, #tpu.memory_space<vmem>>, vector<1x24x8xbf16>
      %207 = vector.shape_cast %206 : vector<1x24x8xbf16> to vector<24x8xbf16>
      %cst_150 = arith.constant dense<0.000000e+00> : vector<128x8xf32>
      %208 = tpu.matmul %154, %207, %cst_150 {dimension_numbers = #tpu.dot_dimension_numbers<[1], [0], [0], [1], [0, 0, 1, 1], [], []>} : vector<128x24xbf16>, vector<24x8xbf16>, vector<128x8xf32> -> vector<128x8xf32>
      %c2_151 = arith.constant 2 : index
      %c0_152 = arith.constant 0 : index
      %c0_153 = arith.constant 0 : index
      %209 = vector.load %arg9[%c2_151, %c0_152, %c0_153] : memref<4x1x8xf32, #tpu.memory_space<vmem>>, vector<1x1x8xf32>
      %210 = vector.shape_cast %209 : vector<1x1x8xf32> to vector<1x8xf32>
      %211 = vector.broadcast %210 : vector<1x8xf32> to vector<128x8xf32>
      %212 = arith.addf %208, %211 : vector<128x8xf32>
      %213 = arith.truncf %205 : vector<128x8xf32> to vector<128x8xbf16>
      %c2_154 = arith.constant 2 : index
      %c0_155 = arith.constant 0 : index
      %c0_156 = arith.constant 0 : index
      %214 = vector.load %arg13[%c2_154, %c0_155, %c0_156] : memref<4x128x8xbf16, #tpu.memory_space<vmem>>, vector<1x128x8xbf16>
      %215 = vector.shape_cast %214 : vector<1x128x8xbf16> to vector<128x8xbf16>
      %216 = vector.shape_cast %213 : vector<128x8xbf16> to vector<1x128x8xbf16>
      tpu.vector_store %arg13[%c2_154, %c0_155, %c0_156], %216 {strides = array<i32>} : memref<4x128x8xbf16, #tpu.memory_space<vmem>>, vector<1x128x8xbf16>,
      %217 = arith.truncf %212 : vector<128x8xf32> to vector<128x8xbf16>
      %c2_157 = arith.constant 2 : index
      %c0_158 = arith.constant 0 : index
      %c0_159 = arith.constant 0 : index
      %218 = vector.load %arg14[%c2_157, %c0_158, %c0_159] : memref<4x128x8xbf16, #tpu.memory_space<vmem>>, vector<1x128x8xbf16>
      %219 = vector.shape_cast %218 : vector<1x128x8xbf16> to vector<128x8xbf16>
      %220 = vector.shape_cast %217 : vector<128x8xbf16> to vector<1x128x8xbf16>
      tpu.vector_store %arg14[%c2_157, %c0_158, %c0_159], %220 {strides = array<i32>} : memref<4x128x8xbf16, #tpu.memory_space<vmem>>, vector<1x128x8xbf16>,
      %c3_160 = arith.constant 3 : index
      %c0_161 = arith.constant 0 : index
      %c0_162 = arith.constant 0 : index
      %221 = vector.load %arg6[%c3_160, %c0_161, %c0_162] : memref<4x24x8xbf16, #tpu.memory_space<vmem>>, vector<1x24x8xbf16>
      %222 = vector.shape_cast %221 : vector<1x24x8xbf16> to vector<24x8xbf16>
      %cst_163 = arith.constant dense<0.000000e+00> : vector<128x8xf32>
      %223 = tpu.matmul %154, %222, %cst_163 {dimension_numbers = #tpu.dot_dimension_numbers<[1], [0], [0], [1], [0, 0, 1, 1], [], []>} : vector<128x24xbf16>, vector<24x8xbf16>, vector<128x8xf32> -> vector<128x8xf32>
      %c3_164 = arith.constant 3 : index
      %c0_165 = arith.constant 0 : index
      %c0_166 = arith.constant 0 : index
      %224 = vector.load %arg7[%c3_164, %c0_165, %c0_166] : memref<4x1x8xf32, #tpu.memory_space<vmem>>, vector<1x1x8xf32>
      %225 = vector.shape_cast %224 : vector<1x1x8xf32> to vector<1x8xf32>
      %226 = vector.broadcast %225 : vector<1x8xf32> to vector<128x8xf32>
      %227 = arith.addf %223, %226 : vector<128x8xf32>
      %c3_167 = arith.constant 3 : index
      %c0_168 = arith.constant 0 : index
      %c0_169 = arith.constant 0 : index
      %228 = vector.load %arg8[%c3_167, %c0_168, %c0_169] : memref<4x24x8xbf16, #tpu.memory_space<vmem>>, vector<1x24x8xbf16>
      %229 = vector.shape_cast %228 : vector<1x24x8xbf16> to vector<24x8xbf16>
      %cst_170 = arith.constant dense<0.000000e+00> : vector<128x8xf32>
      %230 = tpu.matmul %154, %229, %cst_170 {dimension_numbers = #tpu.dot_dimension_numbers<[1], [0], [0], [1], [0, 0, 1, 1], [], []>} : vector<128x24xbf16>, vector<24x8xbf16>, vector<128x8xf32> -> vector<128x8xf32>
      %c3_171 = arith.constant 3 : index
      %c0_172 = arith.constant 0 : index
      %c0_173 = arith.constant 0 : index
      %231 = vector.load %arg9[%c3_171, %c0_172, %c0_173] : memref<4x1x8xf32, #tpu.memory_space<vmem>>, vector<1x1x8xf32>
      %232 = vector.shape_cast %231 : vector<1x1x8xf32> to vector<1x8xf32>
      %233 = vector.broadcast %232 : vector<1x8xf32> to vector<128x8xf32>
      %234 = arith.addf %230, %233 : vector<128x8xf32>
      %235 = arith.truncf %227 : vector<128x8xf32> to vector<128x8xbf16>
      %c3_174 = arith.constant 3 : index
      %c0_175 = arith.constant 0 : index
      %c0_176 = arith.constant 0 : index
      %236 = vector.load %arg13[%c3_174, %c0_175, %c0_176] : memref<4x128x8xbf16, #tpu.memory_space<vmem>>, vector<1x128x8xbf16>
      %237 = vector.shape_cast %236 : vector<1x128x8xbf16> to vector<128x8xbf16>
      %238 = vector.shape_cast %235 : vector<128x8xbf16> to vector<1x128x8xbf16>
      tpu.vector_store %arg13[%c3_174, %c0_175, %c0_176], %238 {strides = array<i32>} : memref<4x128x8xbf16, #tpu.memory_space<vmem>>, vector<1x128x8xbf16>,
      %239 = arith.truncf %234 : vector<128x8xf32> to vector<128x8xbf16>
      %c3_177 = arith.constant 3 : index
      %c0_178 = arith.constant 0 : index
      %c0_179 = arith.constant 0 : index
      %240 = vector.load %arg14[%c3_177, %c0_178, %c0_179] : memref<4x128x8xbf16, #tpu.memory_space<vmem>>, vector<1x128x8xbf16>
      %241 = vector.shape_cast %240 : vector<1x128x8xbf16> to vector<128x8xbf16>
      %242 = vector.shape_cast %239 : vector<128x8xbf16> to vector<1x128x8xbf16>
      tpu.vector_store %arg14[%c3_177, %c0_178, %c0_179], %242 {strides = array<i32>} : memref<4x128x8xbf16, #tpu.memory_space<vmem>>, vector<1x128x8xbf16>,
    } else {
    }
    %c0 = arith.constant 0 : index
    %c0_1 = arith.constant 0 : index
    %c0_2 = arith.constant 0 : index
    %3 = vector.load %arg2[%c0, %c0_1, %c0_2] : memref<1x8x32xf32, #tpu.memory_space<vmem>>, vector<1x8x32xf32>
    %4 = vector.shape_cast %3 : vector<1x8x32xf32> to vector<8x32xf32>
    %5 = arith.truncf %4 : vector<8x32xf32> to vector<8x32xbf16>
    %6 = tpu.iota {dimensions = array<i32: 1>} : vector<8x128xi32>
    %c8_i32 = arith.constant 8 : i32
    %7 = vector.broadcast %c8_i32 : i32 to vector<8x128xi32>
    %8 = arith.cmpi slt, %6, %7 : vector<8x128xi32>
    %cst = arith.constant 0.000000e+00 : f32
    %9 = vector.broadcast %cst : f32 to vector<8x32xf32>
    %c0_3 = arith.constant 0 : index
    %c0_4 = arith.constant 0 : index
    %c0_5 = arith.constant 0 : index
    %10 = vector.load %arg4[%c0_3, %c0_4, %c0_5] : memref<4x32x8xbf16, #tpu.memory_space<vmem>>, vector<1x32x8xbf16>
    %11 = vector.shape_cast %10 : vector<1x32x8xbf16> to vector<32x8xbf16>
    %cst_6 = arith.constant dense<0.000000e+00> : vector<8x8xf32>
    %12 = tpu.matmul %5, %11, %cst_6 {dimension_numbers = #tpu.dot_dimension_numbers<[1], [0], [0], [1], [0, 0, 1, 1], [], []>} : vector<8x32xbf16>, vector<32x8xbf16>, vector<8x8xf32> -> vector<8x8xf32>
    %c0_7 = arith.constant 0 : index
    %c0_8 = arith.constant 0 : index
    %c0_9 = arith.constant 0 : index
    %13 = vector.load %arg5[%c0_7, %c0_8, %c0_9] : memref<4x1x8xf32, #tpu.memory_space<vmem>>, vector<1x1x8xf32>
    %14 = vector.shape_cast %13 : vector<1x1x8xf32> to vector<1x8xf32>
    %15 = vector.broadcast %14 : vector<1x8xf32> to vector<8x8xf32>
    %16 = arith.addf %12, %15 : vector<8x8xf32>
    %cst_10 = arith.constant 0.353553385 : f32
    %17 = vector.broadcast %cst_10 : f32 to vector<8x8xf32>
    %18 = arith.mulf %16, %17 : vector<8x8xf32>
    %19 = arith.truncf %18 : vector<8x8xf32> to vector<8x8xbf16>
    %c0_11 = arith.constant 0 : index
    %c0_12 = arith.constant 0 : index
    %c0_13 = arith.constant 0 : index
    %20 = vector.load %arg13[%c0_11, %c0_12, %c0_13] : memref<4x128x8xbf16, #tpu.memory_space<vmem>>, vector<1x128x8xbf16>
    %21 = vector.shape_cast %20 : vector<1x128x8xbf16> to vector<128x8xbf16>
    %cst_14 = arith.constant dense<0.000000e+00> : vector<8x128xf32>
    %22 = tpu.matmul %19, %21, %cst_14 {dimension_numbers = #tpu.dot_dimension_numbers<[1], [1], [0], [0], [0, 0, 1, 0], [], []>} : vector<8x8xbf16>, vector<128x8xbf16>, vector<8x128xf32> -> vector<8x128xf32>
    %cst_15 = arith.constant -1.000000e+30 : f32
    %23 = vector.broadcast %cst_15 : f32 to vector<8x128xf32>
    %24 = arith.select %8, %22, %23 : vector<8x128xi1>, vector<8x128xf32>
    %cst_16 = arith.constant dense<0xFF800000> : vector<8xf32>
    %25 = vector.multi_reduction <maximumf>, %24, %cst_16 [1] : vector<8x128xf32> to vector<8xf32>
    %26 = vector.shape_cast %25 : vector<8xf32> to vector<8x1xf32>
    %27 = vector.broadcast %26 : vector<8x1xf32> to vector<8x128xf32>
    %28 = arith.subf %24, %27 : vector<8x128xf32>
    %29 = math.exp %28 : vector<8x128xf32>
    %cst_17 = arith.constant dense<0.000000e+00> : vector<8xf32>
    %30 = vector.multi_reduction <add>, %29, %cst_17 [1] : vector<8x128xf32> to vector<8xf32>
    %31 = vector.shape_cast %30 : vector<8xf32> to vector<8x1xf32>
    %32 = tpu.reciprocal %31 {approx = true} : vector<8x1xf32> -> vector<8x1xf32>
    %33 = vector.broadcast %32 : vector<8x1xf32> to vector<8x128xf32>
    %34 = arith.mulf %29, %33 : vector<8x128xf32>
    %35 = arith.truncf %34 : vector<8x128xf32> to vector<8x128xbf16>
    %c0_18 = arith.constant 0 : index
    %c0_19 = arith.constant 0 : index
    %c0_20 = arith.constant 0 : index
    %36 = vector.load %arg14[%c0_18, %c0_19, %c0_20] : memref<4x128x8xbf16, #tpu.memory_space<vmem>>, vector<1x128x8xbf16>
    %37 = vector.shape_cast %36 : vector<1x128x8xbf16> to vector<128x8xbf16>
    %cst_21 = arith.constant dense<0.000000e+00> : vector<8x8xf32>
    %38 = tpu.matmul %35, %37, %cst_21 {dimension_numbers = #tpu.dot_dimension_numbers<[1], [0], [0], [1], [0, 0, 1, 1], [], []>} : vector<8x128xbf16>, vector<128x8xbf16>, vector<8x8xf32> -> vector<8x8xf32>
    %39 = arith.truncf %38 : vector<8x8xf32> to vector<8x8xbf16>
    %c0_22 = arith.constant 0 : index
    %c0_23 = arith.constant 0 : index
    %c0_24 = arith.constant 0 : index
    %40 = vector.load %arg10[%c0_22, %c0_23, %c0_24] : memref<4x8x32xbf16, #tpu.memory_space<vmem>>, vector<1x8x32xbf16>
    %41 = vector.shape_cast %40 : vector<1x8x32xbf16> to vector<8x32xbf16>
    %cst_25 = arith.constant dense<0.000000e+00> : vector<8x32xf32>
    %42 = tpu.matmul %39, %41, %cst_25 {dimension_numbers = #tpu.dot_dimension_numbers<[1], [0], [0], [1], [0, 0, 1, 1], [], []>} : vector<8x8xbf16>, vector<8x32xbf16>, vector<8x32xf32> -> vector<8x32xf32>
    %43 = arith.addf %9, %42 : vector<8x32xf32>
    %c1 = arith.constant 1 : index
    %c0_26 = arith.constant 0 : index
    %c0_27 = arith.constant 0 : index
    %44 = vector.load %arg4[%c1, %c0_26, %c0_27] : memref<4x32x8xbf16, #tpu.memory_space<vmem>>, vector<1x32x8xbf16>
    %45 = vector.shape_cast %44 : vector<1x32x8xbf16> to vector<32x8xbf16>
    %cst_28 = arith.constant dense<0.000000e+00> : vector<8x8xf32>
    %46 = tpu.matmul %5, %45, %cst_28 {dimension_numbers = #tpu.dot_dimension_numbers<[1], [0], [0], [1], [0, 0, 1, 1], [], []>} : vector<8x32xbf16>, vector<32x8xbf16>, vector<8x8xf32> -> vector<8x8xf32>
    %c1_29 = arith.constant 1 : index
    %c0_30 = arith.constant 0 : index
    %c0_31 = arith.constant 0 : index
    %47 = vector.load %arg5[%c1_29, %c0_30, %c0_31] : memref<4x1x8xf32, #tpu.memory_space<vmem>>, vector<1x1x8xf32>
    %48 = vector.shape_cast %47 : vector<1x1x8xf32> to vector<1x8xf32>
    %49 = vector.broadcast %48 : vector<1x8xf32> to vector<8x8xf32>
    %50 = arith.addf %46, %49 : vector<8x8xf32>
    %cst_32 = arith.constant 0.353553385 : f32
    %51 = vector.broadcast %cst_32 : f32 to vector<8x8xf32>
    %52 = arith.mulf %50, %51 : vector<8x8xf32>
    %53 = arith.truncf %52 : vector<8x8xf32> to vector<8x8xbf16>
    %c1_33 = arith.constant 1 : index
    %c0_34 = arith.constant 0 : index
    %c0_35 = arith.constant 0 : index
    %54 = vector.load %arg13[%c1_33, %c0_34, %c0_35] : memref<4x128x8xbf16, #tpu.memory_space<vmem>>, vector<1x128x8xbf16>
    %55 = vector.shape_cast %54 : vector<1x128x8xbf16> to vector<128x8xbf16>
    %cst_36 = arith.constant dense<0.000000e+00> : vector<8x128xf32>
    %56 = tpu.matmul %53, %55, %cst_36 {dimension_numbers = #tpu.dot_dimension_numbers<[1], [1], [0], [0], [0, 0, 1, 0], [], []>} : vector<8x8xbf16>, vector<128x8xbf16>, vector<8x128xf32> -> vector<8x128xf32>
    %cst_37 = arith.constant -1.000000e+30 : f32
    %57 = vector.broadcast %cst_37 : f32 to vector<8x128xf32>
    %58 = arith.select %8, %56, %57 : vector<8x128xi1>, vector<8x128xf32>
    %cst_38 = arith.constant dense<0xFF800000> : vector<8xf32>
    %59 = vector.multi_reduction <maximumf>, %58, %cst_38 [1] : vector<8x128xf32> to vector<8xf32>
    %60 = vector.shape_cast %59 : vector<8xf32> to vector<8x1xf32>
    %61 = vector.broadcast %60 : vector<8x1xf32> to vector<8x128xf32>
    %62 = arith.subf %58, %61 : vector<8x128xf32>
    %63 = math.exp %62 : vector<8x128xf32>
    %cst_39 = arith.constant dense<0.000000e+00> : vector<8xf32>
    %64 = vector.multi_reduction <add>, %63, %cst_39 [1] : vector<8x128xf32> to vector<8xf32>
    %65 = vector.shape_cast %64 : vector<8xf32> to vector<8x1xf32>
    %66 = tpu.reciprocal %65 {approx = true} : vector<8x1xf32> -> vector<8x1xf32>
    %67 = vector.broadcast %66 : vector<8x1xf32> to vector<8x128xf32>
    %68 = arith.mulf %63, %67 : vector<8x128xf32>
    %69 = arith.truncf %68 : vector<8x128xf32> to vector<8x128xbf16>
    %c1_40 = arith.constant 1 : index
    %c0_41 = arith.constant 0 : index
    %c0_42 = arith.constant 0 : index
    %70 = vector.load %arg14[%c1_40, %c0_41, %c0_42] : memref<4x128x8xbf16, #tpu.memory_space<vmem>>, vector<1x128x8xbf16>
    %71 = vector.shape_cast %70 : vector<1x128x8xbf16> to vector<128x8xbf16>
    %cst_43 = arith.constant dense<0.000000e+00> : vector<8x8xf32>
    %72 = tpu.matmul %69, %71, %cst_43 {dimension_numbers = #tpu.dot_dimension_numbers<[1], [0], [0], [1], [0, 0, 1, 1], [], []>} : vector<8x128xbf16>, vector<128x8xbf16>, vector<8x8xf32> -> vector<8x8xf32>
    %73 = arith.truncf %72 : vector<8x8xf32> to vector<8x8xbf16>
    %c1_44 = arith.constant 1 : index
    %c0_45 = arith.constant 0 : index
    %c0_46 = arith.constant 0 : index
    %74 = vector.load %arg10[%c1_44, %c0_45, %c0_46] : memref<4x8x32xbf16, #tpu.memory_space<vmem>>, vector<1x8x32xbf16>
    %75 = vector.shape_cast %74 : vector<1x8x32xbf16> to vector<8x32xbf16>
    %cst_47 = arith.constant dense<0.000000e+00> : vector<8x32xf32>
    %76 = tpu.matmul %73, %75, %cst_47 {dimension_numbers = #tpu.dot_dimension_numbers<[1], [0], [0], [1], [0, 0, 1, 1], [], []>} : vector<8x8xbf16>, vector<8x32xbf16>, vector<8x32xf32> -> vector<8x32xf32>
    %77 = arith.addf %43, %76 : vector<8x32xf32>
    %c2 = arith.constant 2 : index
    %c0_48 = arith.constant 0 : index
    %c0_49 = arith.constant 0 : index
    %78 = vector.load %arg4[%c2, %c0_48, %c0_49] : memref<4x32x8xbf16, #tpu.memory_space<vmem>>, vector<1x32x8xbf16>
    %79 = vector.shape_cast %78 : vector<1x32x8xbf16> to vector<32x8xbf16>
    %cst_50 = arith.constant dense<0.000000e+00> : vector<8x8xf32>
    %80 = tpu.matmul %5, %79, %cst_50 {dimension_numbers = #tpu.dot_dimension_numbers<[1], [0], [0], [1], [0, 0, 1, 1], [], []>} : vector<8x32xbf16>, vector<32x8xbf16>, vector<8x8xf32> -> vector<8x8xf32>
    %c2_51 = arith.constant 2 : index
    %c0_52 = arith.constant 0 : index
    %c0_53 = arith.constant 0 : index
    %81 = vector.load %arg5[%c2_51, %c0_52, %c0_53] : memref<4x1x8xf32, #tpu.memory_space<vmem>>, vector<1x1x8xf32>
    %82 = vector.shape_cast %81 : vector<1x1x8xf32> to vector<1x8xf32>
    %83 = vector.broadcast %82 : vector<1x8xf32> to vector<8x8xf32>
    %84 = arith.addf %80, %83 : vector<8x8xf32>
    %cst_54 = arith.constant 0.353553385 : f32
    %85 = vector.broadcast %cst_54 : f32 to vector<8x8xf32>
    %86 = arith.mulf %84, %85 : vector<8x8xf32>
    %87 = arith.truncf %86 : vector<8x8xf32> to vector<8x8xbf16>
    %c2_55 = arith.constant 2 : index
    %c0_56 = arith.constant 0 : index
    %c0_57 = arith.constant 0 : index
    %88 = vector.load %arg13[%c2_55, %c0_56, %c0_57] : memref<4x128x8xbf16, #tpu.memory_space<vmem>>, vector<1x128x8xbf16>
    %89 = vector.shape_cast %88 : vector<1x128x8xbf16> to vector<128x8xbf16>
    %cst_58 = arith.constant dense<0.000000e+00> : vector<8x128xf32>
    %90 = tpu.matmul %87, %89, %cst_58 {dimension_numbers = #tpu.dot_dimension_numbers<[1], [1], [0], [0], [0, 0, 1, 0], [], []>} : vector<8x8xbf16>, vector<128x8xbf16>, vector<8x128xf32> -> vector<8x128xf32>
    %cst_59 = arith.constant -1.000000e+30 : f32
    %91 = vector.broadcast %cst_59 : f32 to vector<8x128xf32>
    %92 = arith.select %8, %90, %91 : vector<8x128xi1>, vector<8x128xf32>
    %cst_60 = arith.constant dense<0xFF800000> : vector<8xf32>
    %93 = vector.multi_reduction <maximumf>, %92, %cst_60 [1] : vector<8x128xf32> to vector<8xf32>
    %94 = vector.shape_cast %93 : vector<8xf32> to vector<8x1xf32>
    %95 = vector.broadcast %94 : vector<8x1xf32> to vector<8x128xf32>
    %96 = arith.subf %92, %95 : vector<8x128xf32>
    %97 = math.exp %96 : vector<8x128xf32>
    %cst_61 = arith.constant dense<0.000000e+00> : vector<8xf32>
    %98 = vector.multi_reduction <add>, %97, %cst_61 [1] : vector<8x128xf32> to vector<8xf32>
    %99 = vector.shape_cast %98 : vector<8xf32> to vector<8x1xf32>
    %100 = tpu.reciprocal %99 {approx = true} : vector<8x1xf32> -> vector<8x1xf32>
    %101 = vector.broadcast %100 : vector<8x1xf32> to vector<8x128xf32>
    %102 = arith.mulf %97, %101 : vector<8x128xf32>
    %103 = arith.truncf %102 : vector<8x128xf32> to vector<8x128xbf16>
    %c2_62 = arith.constant 2 : index
    %c0_63 = arith.constant 0 : index
    %c0_64 = arith.constant 0 : index
    %104 = vector.load %arg14[%c2_62, %c0_63, %c0_64] : memref<4x128x8xbf16, #tpu.memory_space<vmem>>, vector<1x128x8xbf16>
    %105 = vector.shape_cast %104 : vector<1x128x8xbf16> to vector<128x8xbf16>
    %cst_65 = arith.constant dense<0.000000e+00> : vector<8x8xf32>
    %106 = tpu.matmul %103, %105, %cst_65 {dimension_numbers = #tpu.dot_dimension_numbers<[1], [0], [0], [1], [0, 0, 1, 1], [], []>} : vector<8x128xbf16>, vector<128x8xbf16>, vector<8x8xf32> -> vector<8x8xf32>
    %107 = arith.truncf %106 : vector<8x8xf32> to vector<8x8xbf16>
    %c2_66 = arith.constant 2 : index
    %c0_67 = arith.constant 0 : index
    %c0_68 = arith.constant 0 : index
    %108 = vector.load %arg10[%c2_66, %c0_67, %c0_68] : memref<4x8x32xbf16, #tpu.memory_space<vmem>>, vector<1x8x32xbf16>
    %109 = vector.shape_cast %108 : vector<1x8x32xbf16> to vector<8x32xbf16>
    %cst_69 = arith.constant dense<0.000000e+00> : vector<8x32xf32>
    %110 = tpu.matmul %107, %109, %cst_69 {dimension_numbers = #tpu.dot_dimension_numbers<[1], [0], [0], [1], [0, 0, 1, 1], [], []>} : vector<8x8xbf16>, vector<8x32xbf16>, vector<8x32xf32> -> vector<8x32xf32>
    %111 = arith.addf %77, %110 : vector<8x32xf32>
    %c3 = arith.constant 3 : index
    %c0_70 = arith.constant 0 : index
    %c0_71 = arith.constant 0 : index
    %112 = vector.load %arg4[%c3, %c0_70, %c0_71] : memref<4x32x8xbf16, #tpu.memory_space<vmem>>, vector<1x32x8xbf16>
    %113 = vector.shape_cast %112 : vector<1x32x8xbf16> to vector<32x8xbf16>
    %cst_72 = arith.constant dense<0.000000e+00> : vector<8x8xf32>
    %114 = tpu.matmul %5, %113, %cst_72 {dimension_numbers = #tpu.dot_dimension_numbers<[1], [0], [0], [1], [0, 0, 1, 1], [], []>} : vector<8x32xbf16>, vector<32x8xbf16>, vector<8x8xf32> -> vector<8x8xf32>
    %c3_73 = arith.constant 3 : index
    %c0_74 = arith.constant 0 : index
    %c0_75 = arith.constant 0 : index
    %115 = vector.load %arg5[%c3_73, %c0_74, %c0_75] : memref<4x1x8xf32, #tpu.memory_space<vmem>>, vector<1x1x8xf32>
    %116 = vector.shape_cast %115 : vector<1x1x8xf32> to vector<1x8xf32>
    %117 = vector.broadcast %116 : vector<1x8xf32> to vector<8x8xf32>
    %118 = arith.addf %114, %117 : vector<8x8xf32>
    %cst_76 = arith.constant 0.353553385 : f32
    %119 = vector.broadcast %cst_76 : f32 to vector<8x8xf32>
    %120 = arith.mulf %118, %119 : vector<8x8xf32>
    %121 = arith.truncf %120 : vector<8x8xf32> to vector<8x8xbf16>
    %c3_77 = arith.constant 3 : index
    %c0_78 = arith.constant 0 : index
    %c0_79 = arith.constant 0 : index
    %122 = vector.load %arg13[%c3_77, %c0_78, %c0_79] : memref<4x128x8xbf16, #tpu.memory_space<vmem>>, vector<1x128x8xbf16>
    %123 = vector.shape_cast %122 : vector<1x128x8xbf16> to vector<128x8xbf16>
    %cst_80 = arith.constant dense<0.000000e+00> : vector<8x128xf32>
    %124 = tpu.matmul %121, %123, %cst_80 {dimension_numbers = #tpu.dot_dimension_numbers<[1], [1], [0], [0], [0, 0, 1, 0], [], []>} : vector<8x8xbf16>, vector<128x8xbf16>, vector<8x128xf32> -> vector<8x128xf32>
    %cst_81 = arith.constant -1.000000e+30 : f32
    %125 = vector.broadcast %cst_81 : f32 to vector<8x128xf32>
    %126 = arith.select %8, %124, %125 : vector<8x128xi1>, vector<8x128xf32>
    %cst_82 = arith.constant dense<0xFF800000> : vector<8xf32>
    %127 = vector.multi_reduction <maximumf>, %126, %cst_82 [1] : vector<8x128xf32> to vector<8xf32>
    %128 = vector.shape_cast %127 : vector<8xf32> to vector<8x1xf32>
    %129 = vector.broadcast %128 : vector<8x1xf32> to vector<8x128xf32>
    %130 = arith.subf %126, %129 : vector<8x128xf32>
    %131 = math.exp %130 : vector<8x128xf32>
    %cst_83 = arith.constant dense<0.000000e+00> : vector<8xf32>
    %132 = vector.multi_reduction <add>, %131, %cst_83 [1] : vector<8x128xf32> to vector<8xf32>
    %133 = vector.shape_cast %132 : vector<8xf32> to vector<8x1xf32>
    %134 = tpu.reciprocal %133 {approx = true} : vector<8x1xf32> -> vector<8x1xf32>
    %135 = vector.broadcast %134 : vector<8x1xf32> to vector<8x128xf32>
    %136 = arith.mulf %131, %135 : vector<8x128xf32>
    %137 = arith.truncf %136 : vector<8x128xf32> to vector<8x128xbf16>
    %c3_84 = arith.constant 3 : index
    %c0_85 = arith.constant 0 : index
    %c0_86 = arith.constant 0 : index
    %138 = vector.load %arg14[%c3_84, %c0_85, %c0_86] : memref<4x128x8xbf16, #tpu.memory_space<vmem>>, vector<1x128x8xbf16>
    %139 = vector.shape_cast %138 : vector<1x128x8xbf16> to vector<128x8xbf16>
    %cst_87 = arith.constant dense<0.000000e+00> : vector<8x8xf32>
    %140 = tpu.matmul %137, %139, %cst_87 {dimension_numbers = #tpu.dot_dimension_numbers<[1], [0], [0], [1], [0, 0, 1, 1], [], []>} : vector<8x128xbf16>, vector<128x8xbf16>, vector<8x8xf32> -> vector<8x8xf32>
    %141 = arith.truncf %140 : vector<8x8xf32> to vector<8x8xbf16>
    %c3_88 = arith.constant 3 : index
    %c0_89 = arith.constant 0 : index
    %c0_90 = arith.constant 0 : index
    %142 = vector.load %arg10[%c3_88, %c0_89, %c0_90] : memref<4x8x32xbf16, #tpu.memory_space<vmem>>, vector<1x8x32xbf16>
    %143 = vector.shape_cast %142 : vector<1x8x32xbf16> to vector<8x32xbf16>
    %cst_91 = arith.constant dense<0.000000e+00> : vector<8x32xf32>
    %144 = tpu.matmul %141, %143, %cst_91 {dimension_numbers = #tpu.dot_dimension_numbers<[1], [0], [0], [1], [0, 0, 1, 1], [], []>} : vector<8x8xbf16>, vector<8x32xbf16>, vector<8x32xf32> -> vector<8x32xf32>
    %145 = arith.addf %111, %144 : vector<8x32xf32>
    %c0_92 = arith.constant 0 : index
    %c0_93 = arith.constant 0 : index
    %146 = vector.load %arg11[%c0_92, %c0_93] : memref<1x32xf32, #tpu.memory_space<vmem>>, vector<1x32xf32>
    %147 = vector.broadcast %146 : vector<1x32xf32> to vector<8x32xf32>
    %148 = arith.addf %145, %147 : vector<8x32xf32>
    %c0_94 = arith.constant 0 : index
    %c0_95 = arith.constant 0 : index
    %c0_96 = arith.constant 0 : index
    %149 = vector.load %arg12[%c0_94, %c0_95, %c0_96] : memref<1x8x32xf32, #tpu.memory_space<vmem>>, vector<1x8x32xf32>
    %150 = vector.shape_cast %149 : vector<1x8x32xf32> to vector<8x32xf32>
    %151 = vector.shape_cast %148 : vector<8x32xf32> to vector<1x8x32xf32>
    tpu.vector_store %arg12[%c0_94, %c0_95, %c0_96], %151 {strides = array<i32>} : memref<1x8x32xf32, #tpu.memory_space<vmem>>, vector<1x8x32xf32>,
    return
  }
  func.func @transform_0(%arg0: i32, %arg1: i32) -> (i32, i32, i32) {
    %c0_i32 = arith.constant 0 : i32
    %c0_i32_0 = arith.constant 0 : i32
    return %arg0, %arg1, %c0_i32 : i32, i32, i32
  }
  func.func @transform_1(%arg0: i32, %arg1: i32) -> (i32, i32, i32) {
    %c0_i32 = arith.constant 0 : i32
    %c0_i32_0 = arith.constant 0 : i32
    %c0_i32_1 = arith.constant 0 : i32
    return %arg0, %c0_i32, %c0_i32_0 : i32, i32, i32
  }
  func.func @transform_2(%arg0: i32, %arg1: i32) -> (i32, i32, i32) {
    %c0_i32 = arith.constant 0 : i32
    %c0_i32_0 = arith.constant 0 : i32
    %c0_i32_1 = arith.constant 0 : i32
    %c0_i32_2 = arith.constant 0 : i32
    return %c0_i32, %c0_i32_0, %c0_i32_1 : i32, i32, i32
  }
  func.func @transform_3(%arg0: i32, %arg1: i32) -> (i32, i32, i32) {
    %c0_i32 = arith.constant 0 : i32
    %c0_i32_0 = arith.constant 0 : i32
    %c0_i32_1 = arith.constant 0 : i32
    %c0_i32_2 = arith.constant 0 : i32
    return %c0_i32, %c0_i32_0, %c0_i32_1 : i32, i32, i32
  }
  func.func @transform_4(%arg0: i32, %arg1: i32) -> (i32, i32, i32) {
    %c0_i32 = arith.constant 0 : i32
    %c0_i32_0 = arith.constant 0 : i32
    %c0_i32_1 = arith.constant 0 : i32
    %c0_i32_2 = arith.constant 0 : i32
    return %c0_i32, %c0_i32_0, %c0_i32_1 : i32, i32, i32
  }
  func.func @transform_5(%arg0: i32, %arg1: i32) -> (i32, i32, i32) {
    %c0_i32 = arith.constant 0 : i32
    %c0_i32_0 = arith.constant 0 : i32
    %c0_i32_1 = arith.constant 0 : i32
    %c0_i32_2 = arith.constant 0 : i32
    return %c0_i32, %c0_i32_0, %c0_i32_1 : i32, i32, i32
  }
  func.func @transform_6(%arg0: i32, %arg1: i32) -> (i32, i32, i32) {
    %c0_i32 = arith.constant 0 : i32
    %c0_i32_0 = arith.constant 0 : i32
    %c0_i32_1 = arith.constant 0 : i32
    %c0_i32_2 = arith.constant 0 : i32
    return %c0_i32, %c0_i32_0, %c0_i32_1 : i32, i32, i32
  }
  func.func @transform_7(%arg0: i32, %arg1: i32) -> (i32, i32, i32) {
    %c0_i32 = arith.constant 0 : i32
    %c0_i32_0 = arith.constant 0 : i32
    %c0_i32_1 = arith.constant 0 : i32
    %c0_i32_2 = arith.constant 0 : i32
    return %c0_i32, %c0_i32_0, %c0_i32_1 : i32, i32, i32
  }
  func.func @transform_8(%arg0: i32, %arg1: i32) -> (i32, i32, i32) {
    %c0_i32 = arith.constant 0 : i32
    %c0_i32_0 = arith.constant 0 : i32
    %c0_i32_1 = arith.constant 0 : i32
    %c0_i32_2 = arith.constant 0 : i32
    return %c0_i32, %c0_i32_0, %c0_i32_1 : i32, i32, i32
  }
  func.func @transform_9(%arg0: i32, %arg1: i32) -> (i32, i32) {
    %c0_i32 = arith.constant 0 : i32
    %c0_i32_0 = arith.constant 0 : i32
    %c0_i32_1 = arith.constant 0 : i32
    return %c0_i32, %c0_i32_0 : i32, i32
  }
  func.func @transform_10(%arg0: i32, %arg1: i32) -> (i32, i32, i32) {
    %c0_i32 = arith.constant 0 : i32
    %c0_i32_0 = arith.constant 0 : i32
    return %arg0, %arg1, %c0_i32 : i32, i32, i32
  }
}

</mosaic_0001>

<bundles_post_ra>
// kernel: tpu_custom_call.1
= control target key start
LH: loop header
LB: loop body
LE: loop exit
PB: predicated region body
PF: predicated region fallthrough
CT: control target
= control target key end

     0   :  { %s4428_s0 = inlined_call_operand.vmem [shape: f32[2,8,32], index: 0, kind: input, shape index: {}]   ;;  %s4429_s1 = inlined_call_operand.vmem [shape: f32[2,128,24], index: 1, kind: input, shape index: {}]   ;;  %s4430_s2 = inlined_call_operand.vmem [shape: bf16[4,32,8], index: 2, kind: input, shape index: {}]   ;;  %s4431_s3 = inlined_call_operand.vmem [shape: f32[4,1,8], index: 3, kind: input, shape index: {}]   ;;  %s4432_s4 = inlined_call_operand.vmem [shape: bf16[4,24,8], index: 4, kind: input, shape index: {}]   ;;  %s4433_s5 = inlined_call_operand.vmem [shape: f32[4,1,8], index: 5, kind: input, shape index: {}]   ;;  %s4434_s6 = inlined_call_operand.vmem [shape: bf16[4,24,8], index: 6, kind: input, shape index: {}]   ;;  %s4435_s7 = inlined_call_operand.vmem [shape: f32[4,1,8], index: 7, kind: input, shape index: {}]   ;;  %s4436_s8 = inlined_call_operand.vmem [shape: bf16[4,8,32], index: 8, kind: input, shape index: {}]   ;;  %s4437_s9 = inlined_call_operand.vmem [shape: f32[1,32], index: 9, kind: input, shape index: {}]   ;;  %s4438_s10 = inlined_call_operand.hbm [shape: f32[2,8,32], index: 10, kind: output, shape index: {}]  }
   0x1   :  { %4439 = sst [smem:[#allocation7_spill]] %s4428_s0 }
   0x2   :  { %15 = vsyncpa [#allocation5], 0 }
   0x3   :  { %17 = vsyncpa [#allocation5 + $0x1], 0  ;;  %s3637_s13 = smov 0   ;;  %s3639_s14 = smov 0  }
   0x4   :  { %s3641_s15 = smov 0   ;;  %s3643_s16 = smov 0  }
   0x5   :  { %s3645_s17 = smov 0   ;;  %s3647_s18 = smov 0  }
   0x6 LB: > { %s2677_s19 = sadd.s32 4294967295, %s3577_s18   ;;  %s2678_s20 = sadd.s32 4294967294, %s3577_s18   ;;  %s3577_s18 = sphi %s3647_s18, %s23_s18   ;;  %s3573_s17 = sphi %s3645_s17, %s4447_s17   ;;  %s3569_s16 = sphi %s3643_s16, %s4446_s16   ;;  %s3565_s15 = sphi %s3641_s15, %s4445_s15   ;;  %s3561_s14 = sphi %s3639_s14, %s4444_s14   ;;  %s3557_s13 = sphi %s3637_s13, %s4443_s13  }
   0x7   : > { %s35_s21 = sadd.s32 1, %s3573_s17  ;;  %s266_s22 = sadd.s32 1, %s3565_s15 }
   0x8   : > { %p37_p0 = scmp.ge.s32.totalorder %s35_s21, 2  ;;  %p276_p1 = scmp.ne.s32.totalorder %s3565_s15, %s3561_s14 }
   0x9   : > { %p277_p2 = scmp.eq.s32.totalorder %s2677_s19, 1  ;;  %p282_p3 = scmp.ne.s32.totalorder %s3561_s14, %s3557_s13 }
   0xa   : > { %s4449_s21 = smov (%p37_p0, %s35_s21), 0  ;;  %p283_p5 = scmp.eq.s32.totalorder %s2678_s20, 1 }
   0xb   : > { %p3677_p4 = por %p277_p2, %p276_p1  ;;  %s261_s24 = ssub.s32 %s3573_s17, %s4449_s21 }
   0xc   : > { %p2681_p6 = scmp.ge.s32.totalorder %s3577_s18, 1  ;;  %p264_p7 = scmp.eq.s32.totalorder %s261_s24, 0 }
   0xd   : > { %p3684_p8 = por %p283_p5, %p282_p3  ;;  %p343_p9 = scmp.lt.s32.totalorder %s3577_s18, 3 }
   0xe   : > { %s3690_s26 = scalar_select %p264_p7, %s3565_s15, %s266_s22  }
   0xf   : > { %p344_p10 = pnand %p2681_p6, %p343_p9 }
  0x10   : > { %v3459_v0 = vld [vmem:[%s4432_s4] sm:$0xff] (!%p344_p10)   ;;  %v3460_v1 = vld [vmem:[%s4432_s4 + $0x8] ss:$0 sps:$4 sm:$0xff] (!%p344_p10)   ;;  %vm473_vm0 = vcmask (!%p344_p10), 1043456   ;;  %p388_p11 = scmp.lt.s32.totalorder (!%p344_p10), %s3569_s16, 1  ;;  %v3461_v3 = vld [vmem:[%s4432_s4 + $0xc] sm:$0xff] (!%p344_p10)  }
  0x11   : > { %347 = sbr.rel (%p344_p10) target bundleno = 4044 (0xfcc), region = 60  ;;  %3018 = vmatprep.subr.bf16.mxu0 (!%p344_p10), %v3459_v0  ;;  %v475_v2 = vsel (!%p344_p10), %vm473_vm0, %v3460_v1, 0  ;;  %vm448_vm1 = vcmask (!%p344_p10), 195584   ;;  %v3462_v13 = vld [vmem:[%s4432_s4 + $0x14] ss:$0 sps:$4 sm:$0xff] (!%p344_p10)   ;;  %v3463_v15 = vld [vmem:[%s4432_s4 + $0x18] sm:$0xff] (!%p344_p10)  }
  0x12   : > { %3019 = vmatpush3.bf16.msra.mxu0 (!%p344_p10), %v3459_v0  ;;  %v748_v19 = vsel (!%p344_p10), %vm473_vm0, %v3462_v13, 0  ;;  %v3469_v21 = vld [vmem:[%s4434_s6] sm:$0xff] (!%p344_p10)   ;;  %v3470_v23 = vld [vmem:[%s4434_s6 + $0x8] ss:$0 sps:$4 sm:$0xff] (!%p344_p10)   ;;  %v3471_v27 = vld [vmem:[%s4434_s6 + $0xc] sm:$0xff] (!%p344_p10)   ;;  %v3579_v45 = vmov (!%p344_p10), 0.0  }
  0x13   : > { %3394 = vmatprep.subr.msk.bf16.mxu0 (!%p344_p10), %vm473_vm0, %v3460_v1  ;;  %3038 = vmatprep.subr.bf16.mxu1 (!%p344_p10), %v3469_v21  ;;  %v594_v26 = vsel (!%p344_p10), %vm473_vm0, %v3470_v23, 0  ;;  %v3472_v30 = vld [vmem:[%s4434_s6 + $0x14] ss:$0 sps:$4 sm:$0xff] (!%p344_p10)   ;;  %v3473_v34 = vld [vmem:[%s4434_s6 + $0x18] sm:$0xff] (!%p344_p10)   ;;  %v3464_v38 = vld [vmem:[%s4432_s4 + $0x20] ss:$0 sps:$4 sm:$0xff] (!%p344_p10)  }
  0x14   : > { %3039 = vmatpush3.bf16.msra.mxu1 (!%p344_p10), %v3469_v21  ;;  %v869_v33 = vsel (!%p344_p10), %vm473_vm0, %v3472_v30, 0  ;;  %v1024_v39 = vsel (!%p344_p10), %vm473_vm0, %v3464_v38, 0  ;;  %v3465_v40 = vld [vmem:[%s4432_s4 + $0x24] sm:$0xff] (!%p344_p10)   ;;  %v3474_v41 = vld [vmem:[%s4434_s6 + $0x20] ss:$0 sps:$4 sm:$0xff] (!%p344_p10)   ;;  %s4442_s0 = sld [smem:[#allocation7_spill]] (!%p344_p10) }
  0x15   : > { %3395 = vmatprep.subr.msk.bf16.mxu1 (!%p344_p10), %vm473_vm0, %v3470_v23  ;;  %v1145_v42 = vsel (!%p344_p10), %vm473_vm0, %v3474_v41, 0  ;;  %v3466_v43 = vld [vmem:[%s4432_s4 + $0x2c] ss:$0 sps:$4 sm:$0xff] (!%p344_p10)   ;;  %v3475_v46 = vld [vmem:[%s4434_s6 + $0x24] sm:$0xff] (!%p344_p10)   ;;  %vm3580_vm2 = vmmov (!%p344_p10), 0   ;;  %vm1582_vm3 = vcmask (!%p344_p10), 261120  }
  0x16   : > { %3021 = vmatpush3.bf16.msra.mxu0 (!%p344_p10), %v475_v2  ;;  %v1300_v44 = vsel (!%p344_p10), %vm473_vm0, %v3466_v43, 0  ;;  %v3476_v47 = vld [vmem:[%s4434_s6 + $0x2c] ss:$0 sps:$4 sm:$0xff] (!%p344_p10)   ;;  %v3467_v49 = vld [vmem:[%s4430_s2] sm:$0xff] (!%p344_p10)   ;;  %vm701_vm4 = vcmask (!%p344_p10), 64512   ;;  %s385_s30 = sand.u32 (!%p344_p10), 1, %s3561_s14  }
  0x17   : > { %3058 = vmatprep.subr.bf16.mxu0 (!%p344_p10), %v3461_v3  ;;  %v1421_v48 = vsel (!%p344_p10), %vm473_vm0, %v3476_v47, 0  ;;  %v3468_v50 = vld [vmem:[%s4430_s2 + $0x8] sm:$0xff] (!%p344_p10)   ;;  %v2686_v54 = vld [vmem:[%s4433_s5] ss:$0 sm:$0xff] (!%p344_p10)  ;;  %s2682_s12 = sshll.u32 (!%p344_p10), %s385_s30, 3  ;;  %s2842_s22 = sshll.u32 (!%p344_p10), %s3569_s16, 7 }
  0x18   : > { %s3700_s11 = scalar_select %p388_p11, %s3569_s16, 1  ;;  %3041 = vmatpush3.bf16.msra.mxu1 %v594_v26 }
  0x19   : > { %3078 = vmatprep.subr.bf16.mxu1 %v3471_v27  ;;  %s4380_s29 = scalar_lea.hbm %s4438_s10, %s2842_s22  ;;  %s2580_s16 = scalar_lea.sflag [#allocation5], %s385_s30 }
  0x1a   : > { %s2845_s20 = sshll.u32 %s3700_s11, 7  ;;  %s2683_s19 = sshll.u32 %s3700_s11, 3 }
  0x1b   : > { %s3711_s27 = scalar_lea.vmem %s4429_s1, %s2845_s20  ;;  %s394_s24 = scalar_lea.vmem %s4442_s0, %s2683_s19 }
  0x1c   : > { %v405_v4 = vld [vmem:[%s3711_s27] sm:$0xff]  ;;  %v406_v5 = vld [vmem:[%s3711_s27 + $0x8] sm:$0xff]  ;;  %v407_v6 = vld [vmem:[%s3711_s27 + $0x10] sm:$0xff]  ;;  %s3581_s19 = smov [#allocation4]  }
  0x1d   : > { %v3716_v7 = vpack.c.bf16 %v406_v5, %v405_v4  ;;  %v408_v8 = vld [vmem:[%s3711_s27 + $0x18] sm:$0xff]  ;;  %v409_v9 = vld [vmem:[%s3711_s27 + $0x20] sm:$0xff]  ;;  %v410_v10 = vld [vmem:[%s3711_s27 + $0x28] sm:$0xff]  ;;  %s3503_s20 = sshll.u32 %s3581_s19, 4  ;;  %s3504_s20 = int_to_ptr.vmem [resolvable:$false] %s3503_s20 }
  0x1e   : > { %v3721_v11 = vpack.c.bf16 %v408_v8, %v407_v6  ;;  %v3723_v12 = vpack.c.bf16 %v410_v10, %v409_v9  ;;  %v411_v14 = vld [vmem:[%s3711_s27 + $0x30] sm:$0xff]  ;;  %v412_v16 = vld [vmem:[%s3711_s27 + $0x38] sm:$0xff]  ;;  %v413_v17 = vld [vmem:[%s3711_s27 + $0x40] sm:$0xff]  ;;  %s3505_s0 = scalar_lea.vmem %s3504_s20, 256 }
  0x1f   : > { %3022 = vmatprep.mubr.msk.bf16.mxu0 %vm448_vm1, %v3716_v7  ;;  %3042 = vmatprep.mubr.msk.bf16.mxu1 %vm448_vm1, %v3716_v7  ;;  %v414_v18 = vld [vmem:[%s3711_s27 + $0x48] sm:$0xff]  ;;  %v3745_v20 = vpack.c.bf16 %v412_v16, %v411_v14  ;;  %v415_v24 = vld [vmem:[%s3711_s27 + $0x50] sm:$0xff]  ;;  %v416_v25 = vld [vmem:[%s3711_s27 + $0x58] sm:$0xff] }
  0x20   : > { %3023 = vmatmul.mubr.msk.bf16.vlgmr.msra.gmra.mrb[0].mxu0 %vm448_vm1, %v3721_v11  ;;  %v3750_v22 = vpack.c.bf16 %v414_v18, %v413_v17  ;;  %v417_v28 = vld [vmem:[%s3711_s27 + $0x60] sm:$0xff]  ;;  %v418_v29 = vld [vmem:[%s3711_s27 + $0x68] sm:$0xff]  ;;  %v3771_v31 = vpack.c.bf16 %v416_v25, %v415_v24  ;;  %3043 = vmatmul.mubr.msk.bf16.vlgmr.msra.gmra.mrb[0].mxu1 %vm448_vm1, %v3721_v11  ;;  %v419_v35 = vld [vmem:[%s3711_s27 + $0x70] sm:$0xff] }
  0x21   : > { %3059 = vmatpush3.bf16.msra.mxu0 %v3461_v3  ;;  %3026 = vmatprep.mubr.msk.bf16.mxu0 %vm448_vm1, %v3723_v12  ;;  %v3773_v32 = vpack.c.bf16 %v418_v29, %v417_v28  ;;  %v420_v36 = vld [vmem:[%s3711_s27 + $0x78] sm:$0xff]  ;;  %v1554_v51 = vld [vmem:[%s394_s24] sm:$0xff]  ;;  %s387_s24 = scalar_lea.vmem [#allocation4], %s2682_s12 }
  0x22   : > { %3396 = vmatprep.subr.msk.bf16.mxu0 %vm473_vm0, %v3462_v13  ;;  %3046 = vmatprep.mubr.msk.bf16.mxu1 %vm448_vm1, %v3723_v12  ;;  %v3790_v37 = vpack.c.bf16 %v420_v36, %v419_v35  ;;  %v3936_v52 = vpack.c.bf16 %v1554_v51, %v1554_v51  ;;  %v3968_v36 = vld [vmem:[%s4433_s5 + $0x1] ss:$0 sm:$0xff]  ;;  %s2594_s11 = sshll.u32 %s387_s24, 4  ;;  %s4382_s11 = int_to_ptr.vmem [resolvable:$true] %s2594_s11 }
  0x23   : > { %3079 = vmatpush3.bf16.msra.mxu1 %v3471_v27  ;;  %s3499_s12 = scalar_lea.vmem %s4382_s11, 128  ;;  %p3506_p1 = scmp.lt.s32.totalorder %s4382_s11, %s3504_s20 }
  0x24   : > { %3397 = vmatprep.subr.msk.bf16.mxu1 %vm473_vm0, %v3472_v30  ;;  %p3500_p12 = scmp.ne.s32.totalorder %s4382_s11, %s3499_s12  ;;  %p3507_p2 = scmp.lt.s32.totalorder %s3505_s0, %s3499_s12 }
  0x25   : > { %3061 = vmatpush3.bf16.msra.mxu0 %v748_v19 }
  0x26   : > { %3098 = vmatprep.subr.bf16.mxu0 %v3463_v15  ;;  %p3501_p13 = pnand %p3500_p12, %p3677_p4  ;;  %p3508_p3 = por %p3507_p2, %p3506_p1 }
  0x27   : > { %3081 = vmatpush3.bf16.msra.mxu1 %v869_v33 }
  0x28   : > { %3027 = vmatmul.mubr.msk.bf16.gmra.mrb[4].mxu0 %vm448_vm1, %v3745_v20  ;;  %3118 = vmatprep.subr.bf16.mxu1 %v3473_v34  ;;  %p3502_p0 = pneg %p3501_p13 }
  0x29   : > { %3030 = vmatprep.mubr.msk.bf16.mxu0 %vm448_vm1, %v3750_v22  ;;  %3047 = vmatmul.mubr.msk.bf16.gmra.mrb[4].mxu1 %vm448_vm1, %v3745_v20 }
  0x2a   : > { %3050 = vmatprep.mubr.msk.bf16.mxu1 %vm448_vm1, %v3750_v22  ;;  %p3509_p5 = pnand %p3508_p3, %p3502_p0 }
  0x30   : > { %3031 = vmatmul.mubr.msk.bf16.gmra.mrb[8].mxu0 %vm448_vm1, %v3771_v31 }
  0x31   : > { %3034 = vmatprep.mubr.msk.bf16.mxu0 %vm448_vm1, %v3773_v32  ;;  %3051 = vmatmul.mubr.msk.bf16.gmra.mrb[8].mxu1 %vm448_vm1, %v3771_v31 }
  0x32   : > { %3054 = vmatprep.mubr.msk.bf16.mxu1 %vm448_vm1, %v3773_v32 }
  0x38   : > { %3035 = vmatmul.mubr.msk.bf16.gmra.mrb[12].mxu0 %vm448_vm1, %v3790_v37 }
  0x39   : > { %3062 = vmatprep.mubr.msk.bf16.mxu0 %vm448_vm1, %v3716_v7  ;;  %3055 = vmatmul.mubr.msk.bf16.gmra.mrb[12].mxu1 %vm448_vm1, %v3790_v37 }
  0x3a   : > { %3082 = vmatprep.mubr.msk.bf16.mxu1 %vm448_vm1, %v3716_v7 }
  0x40   : > { %3063 = vmatmul.mubr.msk.bf16.vlgmr.msra.gmra.mrb[16].mxu0 %vm448_vm1, %v3721_v11 }
  0x41   : > { %3099 = vmatpush3.bf16.msra.mxu0 %v3463_v15  ;;  %3066 = vmatprep.mubr.msk.bf16.mxu0 %vm448_vm1, %v3723_v12 }
  0x42   : > { %3398 = vmatprep.subr.msk.bf16.mxu0 %vm473_vm0, %v3464_v38  ;;  %3083 = vmatmul.mubr.msk.bf16.vlgmr.msra.gmra.mrb[16].mxu1 %vm448_vm1, %v3721_v11 }
  0x43   : > { %3086 = vmatprep.mubr.msk.bf16.mxu1 %vm448_vm1, %v3723_v12  ;;  %3119 = vmatpush3.bf16.msra.mxu1 %v3473_v34 }
  0x44   : > { %3399 = vmatprep.subr.msk.bf16.mxu1 %vm473_vm0, %v3474_v41 }
  0x45   : > { %3101 = vmatpush3.bf16.msra.mxu0 %v1024_v39 }
  0x46   : > { %3138 = vmatprep.subr.bf16.mxu0 %v3465_v40 }
  0x47   : > { %3121 = vmatpush3.bf16.msra.mxu1 %v1145_v42 }
  0x48   : > { %3067 = vmatmul.mubr.msk.bf16.gmra.mrb[20].mxu0 %vm448_vm1, %v3745_v20  ;;  %3158 = vmatprep.subr.bf16.mxu1 %v3475_v46 }
  0x49   : > { %3070 = vmatprep.mubr.msk.bf16.mxu0 %vm448_vm1, %v3750_v22 }
  0x4a   : > { %3087 = vmatmul.mubr.msk.bf16.gmra.mrb[20].mxu1 %vm448_vm1, %v3745_v20 }
  0x4b   : > { %3090 = vmatprep.mubr.msk.bf16.mxu1 %vm448_vm1, %v3750_v22 }
  0x50   : > { %3071 = vmatmul.mubr.msk.bf16.gmra.mrb[24].mxu0 %vm448_vm1, %v3771_v31 }
  0x51   : > { %3074 = vmatprep.mubr.msk.bf16.mxu0 %vm448_vm1, %v3773_v32 }
  0x52   : > { %3091 = vmatmul.mubr.msk.bf16.gmra.mrb[24].mxu1 %vm448_vm1, %v3771_v31 }
  0x53   : > { %3094 = vmatprep.mubr.msk.bf16.mxu1 %vm448_vm1, %v3773_v32 }
  0x58   : > { %3075 = vmatmul.mubr.msk.bf16.gmra.mrb[28].mxu0 %vm448_vm1, %v3790_v37 }
  0x59   : > { %3102 = vmatprep.mubr.msk.bf16.mxu0 %vm448_vm1, %v3716_v7 }
  0x5a   : > { %3095 = vmatmul.mubr.msk.bf16.gmra.mrb[28].mxu1 %vm448_vm1, %v3790_v37 }
  0x5b   : > { %3122 = vmatprep.mubr.msk.bf16.mxu1 %vm448_vm1, %v3716_v7 }
  0x60   : > { %3103 = vmatmul.mubr.msk.bf16.vlgmr.msra.gmra.mrb[32].mxu0 %vm448_vm1, %v3721_v11 }
  0x61   : > { %3139 = vmatpush3.bf16.msra.mxu0 %v3465_v40  ;;  %3106 = vmatprep.mubr.msk.bf16.mxu0 %vm448_vm1, %v3723_v12 }
  0x62   : > { %3400 = vmatprep.subr.msk.bf16.mxu0 %vm473_vm0, %v3466_v43  ;;  %3123 = vmatmul.mubr.msk.bf16.vlgmr.msra.gmra.mrb[32].mxu1 %vm448_vm1, %v3721_v11 }
  0x63   : > { %3126 = vmatprep.mubr.msk.bf16.mxu1 %vm448_vm1, %v3723_v12  ;;  %3159 = vmatpush3.bf16.msra.mxu1 %v3475_v46 }
  0x64   : > { %3401 = vmatprep.subr.msk.bf16.mxu1 %vm473_vm0, %v3476_v47 }
  0x65   : > { %3141 = vmatpush3.bf16.msra.mxu0 %v1300_v44 }
  0x66   : > { %3178 = vmatprep.subr.bf16.mxu0 %v3579_v45 }
  0x67   : > { %3161 = vmatpush3.bf16.msra.mxu1 %v1421_v48 }
  0x68   : > { %3107 = vmatmul.mubr.msk.bf16.gmra.mrb[36].mxu0 %vm448_vm1, %v3745_v20  ;;  %3186 = vmatprep.subr.bf16.mxu1 %v3579_v45 }
  0x69   : > { %3110 = vmatprep.mubr.msk.bf16.mxu0 %vm448_vm1, %v3750_v22 }
  0x6a   : > { %3127 = vmatmul.mubr.msk.bf16.gmra.mrb[36].mxu1 %vm448_vm1, %v3745_v20 }
  0x6b   : > { %3130 = vmatprep.mubr.msk.bf16.mxu1 %vm448_vm1, %v3750_v22 }
  0x70   : > { %3111 = vmatmul.mubr.msk.bf16.gmra.mrb[40].mxu0 %vm448_vm1, %v3771_v31 }
  0x71   : > { %3114 = vmatprep.mubr.msk.bf16.mxu0 %vm448_vm1, %v3773_v32 }
  0x72   : > { %3131 = vmatmul.mubr.msk.bf16.gmra.mrb[40].mxu1 %vm448_vm1, %v3771_v31 }
  0x73   : > { %3134 = vmatprep.mubr.msk.bf16.mxu1 %vm448_vm1, %v3773_v32 }
  0x78   : > { %3115 = vmatmul.mubr.msk.bf16.gmra.mrb[44].mxu0 %vm448_vm1, %v3790_v37 }
  0x79   : > { %3142 = vmatprep.mubr.msk.bf16.mxu0 %vm448_vm1, %v3716_v7 }
  0x7a   : > { %3135 = vmatmul.mubr.msk.bf16.gmra.mrb[44].mxu1 %vm448_vm1, %v3790_v37 }
  0x7b   : > { %3162 = vmatprep.mubr.msk.bf16.mxu1 %vm448_vm1, %v3716_v7 }
  0x80   : > { %3143 = vmatmul.mubr.msk.bf16.vlgmr.msra.gmra.mrb[48].mxu0 %vm448_vm1, %v3721_v11 }
  0x81   : > { %3179 = vmatpush3.bf16.msra.mxu0 %v3467_v49  ;;  %3146 = vmatprep.mubr.msk.bf16.mxu0 %vm448_vm1, %v3723_v12 }
  0x82   : > { %3180 = vmatprep.subr.bf16.mxu0 %v3579_v45  ;;  %3163 = vmatmul.mubr.msk.bf16.vlgmr.msra.gmra.mrb[48].mxu1 %vm448_vm1, %v3721_v11 }
  0x83   : > { %3166 = vmatprep.mubr.msk.bf16.mxu1 %vm448_vm1, %v3723_v12 }
  0x85   : > { %3181 = vmatpush3.bf16.msra.mxu0 %v3468_v50 }
  0x86   : > { %3206 = vmatprep.subr.bf16.mxu0 %v3579_v45 }
  0x88   : > { %3147 = vmatmul.mubr.msk.bf16.gmra.mrb[52].mxu0 %vm448_vm1, %v3745_v20 }
  0x89   : > { %3150 = vmatprep.mubr.msk.bf16.mxu0 %vm448_vm1, %v3750_v22 }
  0x8a   : > { %3167 = vmatmul.mubr.msk.bf16.gmra.mrb[52].mxu1 %vm448_vm1, %v3745_v20 }
  0x8b   : > { %3170 = vmatprep.mubr.msk.bf16.mxu1 %vm448_vm1, %v3750_v22 }
  0x90   : > { %3151 = vmatmul.mubr.msk.bf16.gmra.mrb[56].mxu0 %vm448_vm1, %v3771_v31 }
  0x91   : > { %3154 = vmatprep.mubr.msk.bf16.mxu0 %vm448_vm1, %v3773_v32 }
  0x92   : > { %3171 = vmatmul.mubr.msk.bf16.gmra.mrb[56].mxu1 %vm448_vm1, %v3771_v31 }
  0x93   : > { %3174 = vmatprep.mubr.msk.bf16.mxu1 %vm448_vm1, %v3773_v32 }
  0x98   : > { %3155 = vmatmul.mubr.msk.bf16.gmra.mrb[60].mxu0 %vm448_vm1, %v3790_v37 }
  0x99   : > { %3182 = vmatprep.mubr.msk.bf16.mxu0 %vm3580_vm2, %v3579_v45 }
  0x9a   : > { %3175 = vmatmul.mubr.msk.bf16.gmra.mrb[60].mxu1 %vm448_vm1, %v3790_v37 }
  0x9b   : > { %3202 = vmatprep.mubr.msk.bf16.mxu1 %vm3580_vm2, %v3579_v45 }
  0xa0   : > { %3183 = vmatmul.mubr.msk.bf16.vlgmr.msra.gmra.mrb[64].mxu0 %vm1582_vm3, %v3936_v52 }
  0xa1   : > { %3222 = vmatprep.mubr.msk.bf16.mxu0 %vm3580_vm2, %v3579_v45 }
  0xf3   : > { %v3024_v53 = vpop.f32.mrb[0].mxu0 }
  0xf4   : > { %v511_v55 = vpop.f32.mrb[1].mxu0  ;;  %v520_v57 = vadd.f32 %v3024_v53, %v2686_v54 }
  0xf5   : > { %v3025_v56 = vpop.f32.mrb[2].mxu0  ;;  %v512_v60 = vadd.f32 %v2686_v54, %v511_v55 }
  0xf6   : > { %v523_v58 = vadd.f32 %v3025_v56, %v2686_v54  ;;  %v514_v59 = vpop.f32.mrb[3].mxu0 }
  0xf7   : > { %v515_v61 = vadd.f32 %v2686_v54, %v514_v59 }
  0xf8   : > { %v694_v62 = vpack.c.bf16 %v523_v58, %v520_v57 }
  0xf9   : > { %v693_v63 = vpack.c.bf16 %v515_v61, %v512_v60 }
  0xfa   : > { %703 = vst.msk [vmem:[#allocation2 + $0x8] sm:$0xff] %vm701_vm4, %v694_v62 }
  0xfb   : > { %702 = vst.msk [vmem:[#allocation2] sm:$0xff] %vm701_vm4, %v693_v63  ;;  %v3028_v0 = vpop.f32.mrb[4].mxu0 }
  0xfc   : > { %v527_v1 = vpop.f32.mrb[5].mxu0  ;;  %v536_v3 = vadd.f32 %v3028_v0, %v2686_v54  ;;  %v3044_v0 = vpop.f32.mrb[0].mxu1 }
  0xfd   : > { %v3029_v2 = vpop.f32.mrb[6].mxu0  ;;  %v528_v6 = vadd.f32 %v2686_v54, %v527_v1  ;;  %v3990_v1 = vld [vmem:[%s4435_s7] ss:$0 sm:$0xff] }
  0xfe   : > { %v539_v4 = vadd.f32 %v3029_v2, %v2686_v54  ;;  %v530_v5 = vpop.f32.mrb[7].mxu0 }
  0xff   : > { %v531_v7 = vadd.f32 %v2686_v54, %v530_v5 }
 0x100   : > { %v696_v8 = vpack.c.bf16 %v539_v4, %v536_v3  ;;  %v639_v3 = vadd.f32 %v3044_v0, %v3990_v1  ;;  %v630_v4 = vpop.f32.mrb[1].mxu1 }
 0x101   : > { %v695_v9 = vpack.c.bf16 %v531_v7, %v528_v6  ;;  %v1629_v21 = vld [vmem:[#allocation2 + $0x8] sm:$0xff]  ;;  %v3045_v6 = vpop.f32.mrb[2].mxu1 }
 0x102   : > { %705 = vst.msk [vmem:[#allocation2 + $0x18] sm:$0xff] %vm701_vm4, %v696_v8  ;;  %v1628_v10 = vld [vmem:[#allocation2] sm:$0xff]  ;;  %v1644_v24 = vsel %vm701_vm4, %v1629_v21, 0 }
 0x103   : > { %704 = vst.msk [vmem:[#allocation2 + $0x10] sm:$0xff] %vm701_vm4, %v695_v9  ;;  %v3032_v11 = vpop.f32.mrb[8].mxu0  ;;  %v1641_v12 = vsel %vm701_vm4, %v1628_v10, 0  ;;  %v642_v10 = vadd.f32 %v3045_v6, %v3990_v1 }
 0x104   : > { %v543_v13 = vpop.f32.mrb[9].mxu0  ;;  %3187 = vmatpush3.bf16.xpose.msra.mxu1 %v1641_v12  ;;  %v552_v15 = vadd.f32 %v3032_v11, %v2686_v54 }
 0x105   : > { %v3033_v14 = vpop.f32.mrb[10].mxu0  ;;  %3188 = vmatprep.subr.bf16.mxu1 %v3579_v45  ;;  %v544_v18 = vadd.f32 %v2686_v54, %v543_v13 }
 0x106   : > { %v555_v16 = vadd.f32 %v3033_v14, %v2686_v54  ;;  %v546_v17 = vpop.f32.mrb[11].mxu0 }
 0x107   : > { %v547_v19 = vadd.f32 %v2686_v54, %v546_v17  ;;  %v631_v17 = vadd.f32 %v3990_v1, %v630_v4 }
 0x108   : > { %v698_v20 = vpack.c.bf16 %v555_v16, %v552_v15  ;;  %v711_v15 = vpack.c.bf16 %v642_v10, %v639_v3 }
 0x109   : > { %v697_v22 = vpack.c.bf16 %v547_v19, %v544_v18  ;;  %v1631_v47 = vld [vmem:[#allocation2 + $0x18] sm:$0xff] }
 0x10a   : > { %707 = vst.msk [vmem:[#allocation2 + $0x28] sm:$0xff] %vm701_vm4, %v698_v20  ;;  %v1630_v33 = vld [vmem:[#allocation2 + $0x10] sm:$0xff]  ;;  %v1650_v50 = vsel %vm701_vm4, %v1631_v47, 0  ;;  %719 = vst.msk [vmem:[#allocation3 + $0x8] sm:$0xff] %vm701_vm4, %v711_v15  ;;  %v633_v20 = vpop.f32.mrb[3].mxu1 }
 0x10b   : > { %706 = vst.msk [vmem:[#allocation2 + $0x20] sm:$0xff] %vm701_vm4, %v697_v22  ;;  %v3036_v23 = vpop.f32.mrb[12].mxu0  ;;  %v1647_v37 = vsel %vm701_vm4, %v1630_v33, 0  ;;  %v634_v22 = vadd.f32 %v3990_v1, %v633_v20 }
 0x10c   : > { %v559_v25 = vpop.f32.mrb[13].mxu0  ;;  %3189 = vmatpush3.bf16.xpose.msra.mxu1 %v1644_v24  ;;  %v568_v27 = vadd.f32 %v3036_v23, %v2686_v54  ;;  %v3048_v23 = vpop.f32.mrb[4].mxu1 }
 0x10d   : > { %v3037_v26 = vpop.f32.mrb[14].mxu0  ;;  %3190 = vmatprep.subr.bf16.mxu1 %v3579_v45  ;;  %v560_v30 = vadd.f32 %v2686_v54, %v559_v25  ;;  %v655_v25 = vadd.f32 %v3048_v23, %v3990_v1 }
 0x10e   : > { %v571_v28 = vadd.f32 %v3037_v26, %v2686_v54  ;;  %v562_v29 = vpop.f32.mrb[15].mxu0  ;;  %v646_v26 = vpop.f32.mrb[5].mxu1 }
 0x10f   : > { %v563_v31 = vadd.f32 %v2686_v54, %v562_v29 }
 0x110   : > { %v700_v32 = vpack.c.bf16 %v571_v28, %v568_v27 }
 0x111   : > { %v699_v34 = vpack.c.bf16 %v563_v31, %v560_v30  ;;  %v1633_v14 = vld [vmem:[#allocation2 + $0x28] sm:$0xff]  ;;  %v710_v30 = vpack.c.bf16 %v634_v22, %v631_v17  ;;  %v3049_v31 = vpop.f32.mrb[6].mxu1 }
 0x112   : > { %709 = vst.msk [vmem:[#allocation2 + $0x38] sm:$0xff] %vm701_vm4, %v700_v32  ;;  %v1632_v60 = vld [vmem:[#allocation2 + $0x20] sm:$0xff]  ;;  %v1656_v19 = vsel %vm701_vm4, %v1633_v14, 0  ;;  %v1716_v6 = vld [vmem:[#allocation3 + $0x8] sm:$0xff] }
 0x113   : > { %708 = vst.msk [vmem:[#allocation2 + $0x30] sm:$0xff] %vm701_vm4, %v699_v34  ;;  %v3064_v35 = vpop.f32.mrb[16].mxu0  ;;  %v1653_v63 = vsel %vm701_vm4, %v1632_v60, 0  ;;  %v658_v34 = vadd.f32 %v3049_v31, %v3990_v1  ;;  %718 = vst.msk [vmem:[#allocation3] sm:$0xff] %vm701_vm4, %v710_v30 }
 0x114   : > { %v784_v38 = vpop.f32.mrb[17].mxu0  ;;  %3191 = vmatpush3.bf16.xpose.msra.mxu1 %v1647_v37  ;;  %v793_v40 = vadd.f32 %v3064_v35, %v3968_v36 }
 0x115   : > { %v3065_v39 = vpop.f32.mrb[18].mxu0  ;;  %3192 = vmatprep.subr.bf16.mxu1 %v3579_v45  ;;  %v785_v43 = vadd.f32 %v3968_v36, %v784_v38 }
 0x116   : > { %v796_v41 = vadd.f32 %v3065_v39, %v3968_v36  ;;  %v787_v42 = vpop.f32.mrb[19].mxu0  ;;  %v713_v39 = vpack.c.bf16 %v658_v34, %v655_v25 }
 0x117   : > { %v788_v44 = vadd.f32 %v3968_v36, %v787_v42  ;;  %v4019_v42 = vld [vmem:[%s4433_s5 + $0x2] ss:$0 sm:$0xff] }
 0x118   : > { %v969_v46 = vpack.c.bf16 %v796_v41, %v793_v40  ;;  %v647_v40 = vadd.f32 %v3990_v1, %v646_v26  ;;  %721 = vst.msk [vmem:[#allocation3 + $0x18] sm:$0xff] %vm701_vm4, %v713_v39 }
 0x119   : > { %v968_v48 = vpack.c.bf16 %v788_v44, %v785_v43  ;;  %v649_v43 = vpop.f32.mrb[7].mxu1  ;;  %v1635_v0 = vld [vmem:[#allocation2 + $0x38] sm:$0xff] }
 0x11a   : > { %978 = vst.msk [vmem:[#allocation2 + $0x48] sm:$0xff] %vm701_vm4, %v969_v46  ;;  %v1634_v37 = vld [vmem:[#allocation2 + $0x30] sm:$0xff]  ;;  %v650_v46 = vadd.f32 %v3990_v1, %v649_v43  ;;  %v3052_v47 = vpop.f32.mrb[8].mxu1  ;;  %v1715_v60 = vld [vmem:[#allocation3] sm:$0xff]  ;;  %v1662_v14 = vsel %vm701_vm4, %v1635_v0, 0 }
 0x11b   : > { %977 = vst.msk [vmem:[#allocation2 + $0x40] sm:$0xff] %vm701_vm4, %v968_v48  ;;  %v3068_v49 = vpop.f32.mrb[20].mxu0  ;;  %3207 = vmatpush3.bf16.msra.mxu0 %v1715_v60 }
 0x11c   : > { %v800_v51 = vpop.f32.mrb[21].mxu0  ;;  %3193 = vmatpush3.bf16.xpose.msra.mxu1 %v1650_v50  ;;  %v809_v54 = vadd.f32 %v3068_v49, %v3968_v36  ;;  %v671_v49 = vadd.f32 %v3052_v47, %v3990_v1  ;;  %v662_v50 = vpop.f32.mrb[9].mxu1  ;;  %3208 = vmatprep.subr.bf16.mxu0 %v3579_v45 }
 0x11d   : > { %v3069_v53 = vpop.f32.mrb[22].mxu0  ;;  %3194 = vmatprep.subr.bf16.mxu1 %v3579_v45  ;;  %v801_v57 = vadd.f32 %v3968_v36, %v800_v51 }
 0x11e   : > { %v812_v55 = vadd.f32 %v3069_v53, %v3968_v36  ;;  %v803_v56 = vpop.f32.mrb[23].mxu0 }
 0x11f   : > { %v804_v58 = vadd.f32 %v3968_v36, %v803_v56  ;;  %v663_v56 = vadd.f32 %v3990_v1, %v662_v50  ;;  %3209 = vmatpush3.bf16.msra.mxu0 %v1716_v6  ;;  %v1718_v39 = vld [vmem:[#allocation3 + $0x18] sm:$0xff] }
 0x120   : > { %v971_v59 = vpack.c.bf16 %v812_v55, %v809_v54  ;;  %v712_v55 = vpack.c.bf16 %v650_v46, %v647_v40  ;;  %3210 = vmatprep.subr.bf16.mxu0 %v3579_v45 }
 0x121   : > { %v970_v61 = vpack.c.bf16 %v804_v58, %v801_v57  ;;  %v3053_v57 = vpop.f32.mrb[10].mxu1 }
 0x122   : > { %980 = vst.msk [vmem:[#allocation2 + $0x58] sm:$0xff] %vm701_vm4, %v971_v59  ;;  %720 = vst.msk [vmem:[#allocation3 + $0x10] sm:$0xff] %vm701_vm4, %v712_v55 }
 0x123   : > { %979 = vst.msk [vmem:[#allocation2 + $0x50] sm:$0xff] %vm701_vm4, %v970_v61  ;;  %v3072_v62 = vpop.f32.mrb[24].mxu0  ;;  %v674_v61 = vadd.f32 %v3053_v57, %v3990_v1 }
 0x124   : > { %v816_v2 = vpop.f32.mrb[25].mxu0  ;;  %3195 = vmatpush3.bf16.xpose.msra.mxu1 %v1653_v63  ;;  %v825_v7 = vadd.f32 %v3072_v62, %v3968_v36  ;;  %v665_v62 = vpop.f32.mrb[11].mxu1 }
 0x125   : > { %v3073_v5 = vpop.f32.mrb[26].mxu0  ;;  %3196 = vmatprep.subr.bf16.mxu1 %v3579_v45  ;;  %v817_v11 = vadd.f32 %v3968_v36, %v816_v2  ;;  %v666_v2 = vadd.f32 %v3990_v1, %v665_v62  ;;  %v3056_v3 = vpop.f32.mrb[12].mxu1 }
 0x126   : > { %v828_v8 = vadd.f32 %v3073_v5, %v3968_v36  ;;  %v819_v9 = vpop.f32.mrb[27].mxu0  ;;  %v715_v5 = vpack.c.bf16 %v674_v61, %v671_v49 }
 0x127   : > { %v820_v12 = vadd.f32 %v3968_v36, %v819_v9  ;;  %v714_v9 = vpack.c.bf16 %v666_v2, %v663_v56 }
 0x128   : > { %v973_v13 = vpack.c.bf16 %v828_v8, %v825_v7  ;;  %v687_v7 = vadd.f32 %v3056_v3, %v3990_v1  ;;  %v678_v8 = vpop.f32.mrb[13].mxu1  ;;  %723 = vst.msk [vmem:[#allocation3 + $0x28] sm:$0xff] %vm701_vm4, %v715_v5 }
 0x129   : > { %v972_v16 = vpack.c.bf16 %v820_v12, %v817_v11  ;;  %v679_v10 = vadd.f32 %v3990_v1, %v678_v8  ;;  %v3057_v11 = vpop.f32.mrb[14].mxu1  ;;  %v4041_v12 = vld [vmem:[%s4435_s7 + $0x1] ss:$0 sm:$0xff]  ;;  %722 = vst.msk [vmem:[#allocation3 + $0x20] sm:$0xff] %vm701_vm4, %v714_v9  ;;  %v1717_v31 = vld [vmem:[#allocation3 + $0x10] sm:$0xff] }
 0x12a   : > { %982 = vst.msk [vmem:[#allocation2 + $0x68] sm:$0xff] %vm701_vm4, %v973_v13  ;;  %v690_v15 = vadd.f32 %v3057_v11, %v3990_v1  ;;  %3211 = vmatpush3.bf16.msra.mxu0 %v1717_v31 }
 0x12b   : > { %981 = vst.msk [vmem:[#allocation2 + $0x60] sm:$0xff] %vm701_vm4, %v972_v16  ;;  %v3076_v18 = vpop.f32.mrb[28].mxu0  ;;  %v681_v16 = vpop.f32.mrb[15].mxu1  ;;  %3212 = vmatprep.subr.bf16.mxu0 %v3579_v45 }
 0x12c   : > { %v832_v21 = vpop.f32.mrb[29].mxu0  ;;  %3197 = vmatpush3.bf16.xpose.msra.mxu1 %v1656_v19  ;;  %v841_v27 = vadd.f32 %v3076_v18, %v3968_v36  ;;  %v682_v18 = vadd.f32 %v3990_v1, %v681_v16  ;;  %v3084_v19 = vpop.f32.mrb[16].mxu1 }
 0x12d   : > { %v3077_v24 = vpop.f32.mrb[30].mxu0  ;;  %3198 = vmatprep.subr.bf16.mxu1 %v3579_v45  ;;  %v833_v32 = vadd.f32 %v3968_v36, %v832_v21  ;;  %v717_v21 = vpack.c.bf16 %v690_v15, %v687_v7  ;;  %v914_v22 = vadd.f32 %v3084_v19, %v4041_v12  ;;  %v905_v23 = vpop.f32.mrb[17].mxu1 }
 0x12e   : > { %v844_v28 = vadd.f32 %v3077_v24, %v3968_v36  ;;  %v835_v29 = vpop.f32.mrb[31].mxu0  ;;  %3213 = vmatpush3.bf16.msra.mxu0 %v1718_v39 }
 0x12f   : > { %v836_v33 = vadd.f32 %v3968_v36, %v835_v29  ;;  %v1659_v36 = vsel %vm701_vm4, %v1634_v37, 0  ;;  %v3085_v29 = vpop.f32.mrb[18].mxu1  ;;  %725 = vst.msk [vmem:[#allocation3 + $0x38] sm:$0xff] %vm701_vm4, %v717_v21  ;;  %3214 = vmatprep.subr.bf16.mxu0 %v3579_v45 }
 0x130   : > { %v975_v35 = vpack.c.bf16 %v844_v28, %v841_v27  ;;  %v716_v27 = vpack.c.bf16 %v682_v18, %v679_v10  ;;  %v906_v28 = vadd.f32 %v4041_v12, %v905_v23  ;;  %v1719_v55 = vld [vmem:[#allocation3 + $0x20] sm:$0xff]  ;;  %v1720_v10 = vld [vmem:[#allocation3 + $0x28] sm:$0xff] }
 0x131   : > { %v974_v38 = vpack.c.bf16 %v836_v33, %v833_v32  ;;  %v917_v32 = vadd.f32 %v3085_v29, %v4041_v12  ;;  %v908_v33 = vpop.f32.mrb[19].mxu1  ;;  %v4088_v18 = vld [vmem:[%s4435_s7 + $0x2] ss:$0 sm:$0xff] }
 0x132   : > { %984 = vst.msk [vmem:[#allocation2 + $0x78] sm:$0xff] %vm701_vm4, %v975_v35  ;;  %724 = vst.msk [vmem:[#allocation3 + $0x30] sm:$0xff] %vm701_vm4, %v716_v27  ;;  %v909_v35 = vadd.f32 %v4041_v12, %v908_v33  ;;  %v3088_v37 = vpop.f32.mrb[20].mxu1  ;;  %3215 = vmatpush3.bf16.msra.mxu0 %v1719_v55 }
 0x133   : > { %983 = vst.msk [vmem:[#allocation2 + $0x70] sm:$0xff] %vm701_vm4, %v974_v38  ;;  %v3104_v41 = vpop.f32.mrb[32].mxu0  ;;  %v986_v40 = vpack.c.bf16 %v917_v32, %v914_v22  ;;  %3216 = vmatprep.subr.bf16.mxu0 %v3579_v45 }
 0x134   : > { %v1060_v44 = vpop.f32.mrb[33].mxu0  ;;  %3199 = vmatpush3.bf16.xpose.msra.mxu1 %v1659_v36  ;;  %v1069_v51 = vadd.f32 %v3104_v41, %v4019_v42  ;;  %v930_v41 = vadd.f32 %v3088_v37, %v4041_v12  ;;  %v921_v36 = vpop.f32.mrb[21].mxu1  ;;  %v985_v43 = vpack.c.bf16 %v909_v35, %v906_v28 }
 0x135   : > { %v3105_v48 = vpop.f32.mrb[34].mxu0  ;;  %3200 = vmatprep.subr.bf16.mxu1 %v3579_v45  ;;  %v1061_v58 = vadd.f32 %v4019_v42, %v1060_v44  ;;  %v922_v44 = vadd.f32 %v4041_v12, %v921_v36  ;;  %v3089_v46 = vpop.f32.mrb[22].mxu1  ;;  %995 = vst.msk [vmem:[#allocation3 + $0x48] sm:$0xff] %vm701_vm4, %v986_v40 }
 0x136   : > { %v1072_v53 = vadd.f32 %v3105_v48, %v4019_v42  ;;  %v1063_v54 = vpop.f32.mrb[35].mxu0  ;;  %v933_v48 = vadd.f32 %v3089_v46, %v4041_v12  ;;  %v924_v49 = vpop.f32.mrb[23].mxu1  ;;  %994 = vst.msk [vmem:[#allocation3 + $0x40] sm:$0xff] %vm701_vm4, %v985_v43  ;;  %3217 = vmatpush3.bf16.msra.mxu0 %v1720_v10  ;;  %v1722_v43 = vld [vmem:[#allocation3 + $0x38] sm:$0xff] }
 0x137   : > { %v1064_v59 = vadd.f32 %v4019_v42, %v1063_v54  ;;  %3218 = vmatprep.subr.bf16.mxu0 %v3579_v45 }
 0x138   : > { %v1245_v63 = vpack.c.bf16 %v1072_v53, %v1069_v51  ;;  %v925_v51 = vadd.f32 %v4041_v12, %v924_v49  ;;  %v3092_v53 = vpop.f32.mrb[24].mxu1  ;;  %v988_v56 = vpack.c.bf16 %v933_v48, %v930_v41 }
 0x139   : > { %v1244_v4 = vpack.c.bf16 %v1064_v59, %v1061_v58  ;;  %v946_v57 = vadd.f32 %v3092_v53, %v4041_v12  ;;  %v937_v58 = vpop.f32.mrb[25].mxu1 }
 0x13a   : > { %1254 = vst.msk [vmem:[#allocation2 + $0x88] sm:$0xff] %vm701_vm4, %v1245_v63  ;;  %v987_v62 = vpack.c.bf16 %v925_v51, %v922_v44  ;;  %v938_v63 = vadd.f32 %v4041_v12, %v937_v58  ;;  %v3093_v0 = vpop.f32.mrb[26].mxu1  ;;  %997 = vst.msk [vmem:[#allocation3 + $0x58] sm:$0xff] %vm701_vm4, %v988_v56  ;;  %v4114_v51 = vld [vmem:[%s4433_s5 + $0x3] ss:$0 sm:$0xff] }
 0x13b   : > { %1253 = vst.msk [vmem:[#allocation2 + $0x80] sm:$0xff] %vm701_vm4, %v1244_v4  ;;  %v3108_v13 = vpop.f32.mrb[36].mxu0  ;;  %v949_v4 = vadd.f32 %v3093_v0, %v4041_v12  ;;  %v940_v5 = vpop.f32.mrb[27].mxu1 }
 0x13c   : > { %v1076_v17 = vpop.f32.mrb[37].mxu0  ;;  %3201 = vmatpush3.bf16.xpose.msra.mxu1 %v1662_v14  ;;  %v1085_v24 = vadd.f32 %v3108_v13, %v4019_v42  ;;  %996 = vst.msk [vmem:[#allocation3 + $0x50] sm:$0xff] %vm701_vm4, %v987_v62  ;;  %v941_v7 = vadd.f32 %v4041_v12, %v940_v5  ;;  %v3096_v8 = vpop.f32.mrb[28].mxu1 }
 0x13d   : > { %v3109_v20 = vpop.f32.mrb[38].mxu0  ;;  %3234 = vmatprep.subr.bf16.mxu1 %v3579_v45  ;;  %v1077_v1 = vadd.f32 %v4019_v42, %v1076_v17  ;;  %v990_v11 = vpack.c.bf16 %v949_v4, %v946_v57  ;;  %v962_v13 = vadd.f32 %v3096_v8, %v4041_v12  ;;  %v953_v14 = vpop.f32.mrb[29].mxu1 }
 0x13e   : > { %v1088_v25 = vadd.f32 %v3109_v20, %v4019_v42  ;;  %v1079_v26 = vpop.f32.mrb[39].mxu0  ;;  %v989_v15 = vpack.c.bf16 %v941_v7, %v938_v63  ;;  %v954_v16 = vadd.f32 %v4041_v12, %v953_v14  ;;  %v3097_v17 = vpop.f32.mrb[30].mxu1 }
 0x13f   : > { %v1080_v30 = vadd.f32 %v4019_v42, %v1079_v26  ;;  %999 = vst.msk [vmem:[#allocation3 + $0x68] sm:$0xff] %vm701_vm4, %v990_v11  ;;  %v965_v20 = vadd.f32 %v3097_v17, %v4041_v12  ;;  %v956_v21 = vpop.f32.mrb[31].mxu1  ;;  %v1721_v26 = vld [vmem:[#allocation3 + $0x30] sm:$0xff] }
 0x140   : > { %v1247_v34 = vpack.c.bf16 %v1088_v25, %v1085_v24  ;;  %998 = vst.msk [vmem:[#allocation3 + $0x60] sm:$0xff] %vm701_vm4, %v989_v15  ;;  %v957_v23 = vadd.f32 %v4041_v12, %v956_v21  ;;  %v3124_v24 = vpop.f32.mrb[32].mxu1  ;;  %3219 = vmatpush3.bf16.msra.mxu0 %v1721_v26 }
 0x141   : > { %v1246_v38 = vpack.c.bf16 %v1080_v30, %v1077_v1  ;;  %v992_v27 = vpack.c.bf16 %v965_v20, %v962_v13  ;;  %v1190_v28 = vadd.f32 %v3124_v24, %v4088_v18  ;;  %v1181_v29 = vpop.f32.mrb[33].mxu1  ;;  %3220 = vmatprep.subr.bf16.mxu0 %v3579_v45 }
 0x142   : > { %1256 = vst.msk [vmem:[#allocation2 + $0x98] sm:$0xff] %vm701_vm4, %v1247_v34  ;;  %v991_v32 = vpack.c.bf16 %v957_v23, %v954_v16  ;;  %v1182_v33 = vadd.f32 %v4088_v18, %v1181_v29  ;;  %v3125_v34 = vpop.f32.mrb[34].mxu1 }
 0x143   : > { %1255 = vst.msk [vmem:[#allocation2 + $0x90] sm:$0xff] %vm701_vm4, %v1246_v38  ;;  %v3112_v47 = vpop.f32.mrb[40].mxu0  ;;  %1001 = vst.msk [vmem:[#allocation3 + $0x78] sm:$0xff] %vm701_vm4, %v992_v27  ;;  %v1193_v37 = vadd.f32 %v3125_v34, %v4088_v18  ;;  %v1184_v38 = vpop.f32.mrb[35].mxu1 }
 0x144   : > { %v1092_v50 = vpop.f32.mrb[41].mxu0  ;;  %v1101_v59 = vadd.f32 %v3112_v47, %v4019_v42  ;;  %1000 = vst.msk [vmem:[#allocation3 + $0x70] sm:$0xff] %vm701_vm4, %v991_v32  ;;  %v1185_v40 = vadd.f32 %v4088_v18, %v1184_v38  ;;  %v3128_v41 = vpop.f32.mrb[36].mxu1  ;;  %3221 = vmatpush3.bf16.msra.mxu0 %v1722_v43 }
 0x145   : > { %v3113_v54 = vpop.f32.mrb[42].mxu0  ;;  %v1093_v2 = vadd.f32 %v4019_v42, %v1092_v50  ;;  %v1262_v44 = vpack.c.bf16 %v1193_v37, %v1190_v28  ;;  %v1206_v46 = vadd.f32 %v3128_v41, %v4088_v18  ;;  %3226 = vmatprep.subr.bf16.mxu0 %v3579_v45 }
 0x146   : > { %v1104_v60 = vadd.f32 %v3113_v54, %v4019_v42  ;;  %v1095_v61 = vpop.f32.mrb[43].mxu0  ;;  %v1261_v47 = vpack.c.bf16 %v1185_v40, %v1182_v33  ;;  %v4146_v33 = vld [vmem:[%s4435_s7 + $0x3] ss:$0 sm:$0xff] }
 0x147   : > { %v1096_v3 = vadd.f32 %v4019_v42, %v1095_v61  ;;  %1271 = vst.msk [vmem:[#allocation3 + $0x88] sm:$0xff] %vm701_vm4, %v1262_v44 }
 0x148   : > { %v1249_v6 = vpack.c.bf16 %v1104_v60, %v1101_v59  ;;  %1270 = vst.msk [vmem:[#allocation3 + $0x80] sm:$0xff] %vm701_vm4, %v1261_v47 }
 0x149   : > { %v1248_v9 = vpack.c.bf16 %v1096_v3, %v1093_v2 }
 0x14a   : > { %1258 = vst.msk [vmem:[#allocation2 + $0xa8] sm:$0xff] %vm701_vm4, %v1249_v6 }
 0x14b   : > { %1257 = vst.msk [vmem:[#allocation2 + $0xa0] sm:$0xff] %vm701_vm4, %v1248_v9  ;;  %v3116_v19 = vpop.f32.mrb[44].mxu0 }
 0x14c   : > { %v1108_v22 = vpop.f32.mrb[45].mxu0  ;;  %v1117_v1 = vadd.f32 %v3116_v19, %v4019_v42 }
 0x14d   : > { %v3117_v25 = vpop.f32.mrb[46].mxu0  ;;  %v1109_v12 = vadd.f32 %v4019_v42, %v1108_v22 }
 0x14e   : > { %v1120_v30 = vadd.f32 %v3117_v25, %v4019_v42  ;;  %v1111_v31 = vpop.f32.mrb[47].mxu0 }
 0x14f   : > { %v1112_v35 = vadd.f32 %v4019_v42, %v1111_v31  ;;  %v1197_v42 = vpop.f32.mrb[37].mxu1 }
 0x150   : > { %v1251_v39 = vpack.c.bf16 %v1120_v30, %v1117_v1  ;;  %v1198_v48 = vadd.f32 %v4088_v18, %v1197_v42  ;;  %v3129_v49 = vpop.f32.mrb[38].mxu1 }
 0x151   : > { %v1250_v36 = vpack.c.bf16 %v1112_v35, %v1109_v12  ;;  %v1209_v53 = vadd.f32 %v3129_v49, %v4088_v18  ;;  %v1200_v54 = vpop.f32.mrb[39].mxu1 }
 0x152   : > { %1260 = vst.msk [vmem:[#allocation2 + $0xb8] sm:$0xff] %vm701_vm4, %v1251_v39  ;;  %v1201_v56 = vadd.f32 %v4088_v18, %v1200_v54  ;;  %v3132_v57 = vpop.f32.mrb[40].mxu1 }
 0x153   : > { %1259 = vst.msk [vmem:[#allocation2 + $0xb0] sm:$0xff] %vm701_vm4, %v1250_v36  ;;  %v3144_v50 = vpop.f32.mrb[48].mxu0  ;;  %v1264_v59 = vpack.c.bf16 %v1209_v53, %v1206_v46  ;;  %v1222_v60 = vadd.f32 %v3132_v57, %v4088_v18  ;;  %v1213_v61 = vpop.f32.mrb[41].mxu1 }
 0x154   : > { %v1336_v55 = vpop.f32.mrb[49].mxu0  ;;  %v1345_v62 = vadd.f32 %v3144_v50, %v4114_v51  ;;  %v1263_v2 = vpack.c.bf16 %v1201_v56, %v1198_v48  ;;  %v1214_v3 = vadd.f32 %v4088_v18, %v1213_v61  ;;  %v3133_v4 = vpop.f32.mrb[42].mxu1 }
 0x155   : > { %v3145_v58 = vpop.f32.mrb[50].mxu0  ;;  %v1337_v5 = vadd.f32 %v4114_v51, %v1336_v55  ;;  %1273 = vst.msk [vmem:[#allocation3 + $0x98] sm:$0xff] %vm701_vm4, %v1264_v59  ;;  %v1225_v7 = vadd.f32 %v3133_v4, %v4088_v18  ;;  %v1216_v8 = vpop.f32.mrb[43].mxu1 }
 0x156   : > { %v1348_v63 = vadd.f32 %v3145_v58, %v4114_v51  ;;  %v1339_v0 = vpop.f32.mrb[51].mxu0  ;;  %1272 = vst.msk [vmem:[#allocation3 + $0x90] sm:$0xff] %vm701_vm4, %v1263_v2  ;;  %v1217_v10 = vadd.f32 %v4088_v18, %v1216_v8  ;;  %v3136_v14 = vpop.f32.mrb[44].mxu1 }
 0x157   : > { %v1340_v6 = vadd.f32 %v4114_v51, %v1339_v0  ;;  %v1266_v13 = vpack.c.bf16 %v1225_v7, %v1222_v60  ;;  %v1238_v16 = vadd.f32 %v3136_v14, %v4088_v18  ;;  %v1229_v17 = vpop.f32.mrb[45].mxu1 }
 0x158   : > { %v1521_v9 = vpack.c.bf16 %v1348_v63, %v1345_v62  ;;  %v1265_v15 = vpack.c.bf16 %v1217_v10, %v1214_v3  ;;  %v1230_v20 = vadd.f32 %v4088_v18, %v1229_v17  ;;  %v3137_v21 = vpop.f32.mrb[46].mxu1 }
 0x159   : > { %v1520_v11 = vpack.c.bf16 %v1340_v6, %v1337_v5  ;;  %1275 = vst.msk [vmem:[#allocation3 + $0xa8] sm:$0xff] %vm701_vm4, %v1266_v13  ;;  %v1241_v23 = vadd.f32 %v3137_v21, %v4088_v18  ;;  %v1232_v24 = vpop.f32.mrb[47].mxu1 }
 0x15a   : > { %1530 = vst.msk [vmem:[#allocation2 + $0xc8] sm:$0xff] %vm701_vm4, %v1521_v9  ;;  %1274 = vst.msk [vmem:[#allocation3 + $0xa0] sm:$0xff] %vm701_vm4, %v1265_v15  ;;  %v1233_v26 = vadd.f32 %v4088_v18, %v1232_v24  ;;  %v3164_v12 = vpop.f32.mrb[48].mxu1  ;;  %v2798_v15 = vld [vmem:[%s4431_s3] ss:$0 sm:$0xff] }
 0x15b   : > { %1529 = vst.msk [vmem:[#allocation2 + $0xc0] sm:$0xff] %vm701_vm4, %v1520_v11  ;;  %v3148_v19 = vpop.f32.mrb[52].mxu0  ;;  %v1268_v1 = vpack.c.bf16 %v1241_v23, %v1238_v16  ;;  %v1466_v35 = vadd.f32 %v3164_v12, %v4146_v33  ;;  %v1457_v37 = vpop.f32.mrb[49].mxu1 }
 0x15c   : > { %v1352_v22 = vpop.f32.mrb[53].mxu0  ;;  %v1361_v27 = vadd.f32 %v3148_v19, %v4114_v51  ;;  %v1267_v32 = vpack.c.bf16 %v1233_v26, %v1230_v20  ;;  %v1458_v39 = vadd.f32 %v4146_v33, %v1457_v37  ;;  %v3165_v40 = vpop.f32.mrb[50].mxu1 }
 0x15d   : > { %v3149_v25 = vpop.f32.mrb[54].mxu0  ;;  %v1353_v30 = vadd.f32 %v4114_v51, %v1352_v22  ;;  %1277 = vst.msk [vmem:[#allocation3 + $0xb8] sm:$0xff] %vm701_vm4, %v1268_v1  ;;  %v1469_v36 = vadd.f32 %v3165_v40, %v4146_v33  ;;  %v1460_v43 = vpop.f32.mrb[51].mxu1 }
 0x15e   : > { %v1364_v28 = vadd.f32 %v3149_v25, %v4114_v51  ;;  %v1355_v29 = vpop.f32.mrb[55].mxu0  ;;  %1276 = vst.msk [vmem:[#allocation3 + $0xb0] sm:$0xff] %vm701_vm4, %v1267_v32  ;;  %v1461_v46 = vadd.f32 %v4146_v33, %v1460_v43  ;;  %v3168_v57 = vpop.f32.mrb[52].mxu1  ;;  %v1834_v43 = vld [vmem:[#allocation2 + $0x48] sm:$0xff] }
 0x15f   : > { %v1356_v31 = vadd.f32 %v4114_v51, %v1355_v29  ;;  %v1538_v49 = vpack.c.bf16 %v1469_v36, %v1466_v35  ;;  %v1482_v58 = vadd.f32 %v3168_v57, %v4146_v33  ;;  %v1473_v59 = vpop.f32.mrb[53].mxu1  ;;  %v1840_v57 = vld [vmem:[#allocation2 + $0x78] sm:$0xff] }
 0x160   : > { %v1523_v34 = vpack.c.bf16 %v1364_v28, %v1361_v27  ;;  %v1537_v54 = vpack.c.bf16 %v1461_v46, %v1458_v39  ;;  %v1474_v61 = vadd.f32 %v4146_v33, %v1473_v59  ;;  %v3169_v62 = vpop.f32.mrb[54].mxu1  ;;  %v1848_v46 = vsel %vm701_vm4, %v1834_v43, 0 }
 0x161   : > { %v1522_v18 = vpack.c.bf16 %v1356_v31, %v1353_v30  ;;  %1547 = vst.msk [vmem:[#allocation3 + $0xc8] sm:$0xff] %vm701_vm4, %v1538_v49  ;;  %v1485_v0 = vadd.f32 %v3169_v62, %v4146_v33  ;;  %v1476_v2 = vpop.f32.mrb[55].mxu1  ;;  %v1833_v30 = vld [vmem:[#allocation2 + $0x40] sm:$0xff]  ;;  %v1556_v59 = vlaneseq }
 0x162   : > { %1532 = vst.msk [vmem:[#allocation2 + $0xd8] sm:$0xff] %vm701_vm4, %v1523_v34  ;;  %1546 = vst.msk [vmem:[#allocation3 + $0xc0] sm:$0xff] %vm701_vm4, %v1537_v54  ;;  %v1477_v4 = vadd.f32 %v4146_v33, %v1476_v2  ;;  %v1837_v49 = vld [vmem:[#allocation2 + $0x60] sm:$0xff] }
 0x163   : > { %1531 = vst.msk [vmem:[#allocation2 + $0xd0] sm:$0xff] %vm701_vm4, %v1522_v18  ;;  %v3152_v38 = vpop.f32.mrb[56].mxu0  ;;  %v1540_v8 = vpack.c.bf16 %v1485_v0, %v1482_v58  ;;  %v1845_v18 = vsel %vm701_vm4, %v1833_v30, 0  ;;  %v1866_v58 = vsel %vm701_vm4, %v1840_v57, 0  ;;  %v1764_v57 = vld [vmem:[%s4436_s8] sm:$0xf] }
 0x164   : > { %v1368_v41 = vpop.f32.mrb[57].mxu0  ;;  %v1377_v42 = vadd.f32 %v3152_v38, %v4114_v51  ;;  %v1539_v11 = vpack.c.bf16 %v1477_v4, %v1474_v61 }
 0x165   : > { %v3153_v44 = vpop.f32.mrb[58].mxu0  ;;  %v1369_v50 = vadd.f32 %v4114_v51, %v1368_v41  ;;  %1549 = vst.msk [vmem:[#allocation3 + $0xd8] sm:$0xff] %vm701_vm4, %v1540_v8  ;;  %v3172_v16 = vpop.f32.mrb[56].mxu1 }
 0x166   : > { %v1380_v47 = vadd.f32 %v3153_v44, %v4114_v51  ;;  %v1371_v48 = vpop.f32.mrb[59].mxu0  ;;  %1548 = vst.msk [vmem:[#allocation3 + $0xd0] sm:$0xff] %vm701_vm4, %v1539_v11  ;;  %v1498_v17 = vadd.f32 %v3172_v16, %v4146_v33  ;;  %v1489_v19 = vpop.f32.mrb[57].mxu1  ;;  %v1922_v16 = vld [vmem:[#allocation3 + $0x50] sm:$0xff] }
 0x167   : > { %v1372_v53 = vadd.f32 %v4114_v51, %v1371_v48  ;;  %v1490_v20 = vadd.f32 %v4146_v33, %v1489_v19  ;;  %v3173_v21 = vpop.f32.mrb[58].mxu1  ;;  %v1836_v48 = vld [vmem:[#allocation2 + $0x58] sm:$0xff]  ;;  %v1924_v19 = vld [vmem:[#allocation3 + $0x60] sm:$0xff] }
 0x168   : > { %v1525_v55 = vpack.c.bf16 %v1380_v47, %v1377_v42  ;;  %v1501_v24 = vadd.f32 %v3173_v21, %v4146_v33  ;;  %v1492_v25 = vpop.f32.mrb[59].mxu1  ;;  %v1835_v42 = vld [vmem:[#allocation2 + $0x50] sm:$0xff]  ;;  %v1927_v21 = vld [vmem:[#allocation3 + $0x78] sm:$0xff] }
 0x169   : > { %v1524_v56 = vpack.c.bf16 %v1372_v53, %v1369_v50  ;;  %v1493_v27 = vadd.f32 %v4146_v33, %v1492_v25  ;;  %v1851_v47 = vsel %vm701_vm4, %v1835_v42, 0  ;;  %v1857_v50 = vsel %vm701_vm4, %v1837_v49, 0  ;;  %v1838_v53 = vld [vmem:[#allocation2 + $0x68] sm:$0xff] }
 0x16a   : > { %1534 = vst.msk [vmem:[#allocation2 + $0xe8] sm:$0xff] %vm701_vm4, %v1525_v55  ;;  %v1542_v1 = vpack.c.bf16 %v1501_v24, %v1498_v17  ;;  %v1860_v54 = vsel %vm701_vm4, %v1838_v53, 0  ;;  %v1839_v55 = vld [vmem:[#allocation2 + $0x70] sm:$0xff]  ;;  %v1923_v17 = vld [vmem:[#allocation3 + $0x58] sm:$0xff]  ;;  %v2813_v53 = vld [vmem:[%s4436_s8 + $0x4] sm:$0xf] }
 0x16b   : > { %1533 = vst.msk [vmem:[#allocation2 + $0xe0] sm:$0xff] %vm701_vm4, %v1524_v56  ;;  %v3156_v60 = vpop.f32.mrb[60].mxu0  ;;  %v1541_v31 = vpack.c.bf16 %v1493_v27, %v1490_v20  ;;  %v1863_v56 = vsel %vm701_vm4, %v1839_v55, 0  ;;  %v1926_v20 = vld [vmem:[#allocation3 + $0x70] sm:$0xff] }
 0x16c   : > { %v1384_v63 = vpop.f32.mrb[61].mxu0  ;;  %v1393_v5 = vadd.f32 %v3156_v60, %v4114_v51  ;;  %1551 = vst.msk [vmem:[#allocation3 + $0xe8] sm:$0xff] %vm701_vm4, %v1542_v1  ;;  %v4210_v60 = vand.u32 127, %v1556_v59 }
 0x16d   : > { %v3157_v3 = vpop.f32.mrb[62].mxu0  ;;  %v1385_v9 = vadd.f32 %v4114_v51, %v1384_v63  ;;  %1550 = vst.msk [vmem:[#allocation3 + $0xe0] sm:$0xff] %vm701_vm4, %v1541_v31  ;;  %v3176_v34 = vpop.f32.mrb[60].mxu1 }
 0x16e   : > { %v1396_v6 = vadd.f32 %v3157_v3, %v4114_v51  ;;  %v1387_v7 = vpop.f32.mrb[63].mxu0  ;;  %v1514_v12 = vadd.f32 %v3176_v34, %v4146_v33  ;;  %v1505_v35 = vpop.f32.mrb[61].mxu1  ;;  %vm1558_vm5 = vcmp.lt.s32.totalorder %v4210_v60, 8  ;;  %v2219_v34 = vld [vmem:[#allocation3 + $0x80] sm:$0xff] }
 0x16f   : > { %v1388_v10 = vadd.f32 %v4114_v51, %v1387_v7  ;;  %v1506_v37 = vadd.f32 %v4146_v33, %v1505_v35  ;;  %v3177_v38 = vpop.f32.mrb[62].mxu1  ;;  %v2222_v35 = vld [vmem:[#allocation3 + $0x98] sm:$0xff] }
 0x170   : > { %v1527_v13 = vpack.c.bf16 %v1396_v6, %v1393_v5  ;;  %v1517_v39 = vadd.f32 %v3177_v38, %v4146_v33  ;;  %v1508_v40 = vpop.f32.mrb[63].mxu1  ;;  %v2224_v38 = vld [vmem:[#allocation3 + $0xa8] sm:$0xff] }
 0x171   : > { %v1526_v14 = vpack.c.bf16 %v1388_v10, %v1385_v9  ;;  %v1509_v41 = vadd.f32 %v4146_v33, %v1508_v40  ;;  %v1854_v33 = vsel %vm701_vm4, %v1836_v48, 0  ;;  %v3477_v10 = vld [vmem:[%s4430_s2 + $0x10] sm:$0xff]   ;;  %v2226_v40 = vld [vmem:[#allocation3 + $0xb8] sm:$0xff] }
 0x172   : > { %1536 = vst.msk [vmem:[#allocation2 + $0xf8] sm:$0xff] %vm701_vm4, %v1527_v13  ;;  %v1544_v36 = vpack.c.bf16 %v1517_v39, %v1514_v12  ;;  %v3478_v13 = vld [vmem:[%s4430_s2 + $0x18] sm:$0xff]   ;;  %v2221_v12 = vld [vmem:[#allocation3 + $0x90] sm:$0xff] }
 0x173   : > { %1535 = vst.msk [vmem:[#allocation2 + $0xf0] sm:$0xff] %vm701_vm4, %v1526_v14  ;;  %v1620_v51 = vpop.f32.mrb[64].mxu0  ;;  %v1543_v44 = vpack.c.bf16 %v1509_v41, %v1506_v37  ;;  %v1920_v14 = vld [vmem:[#allocation3 + $0x40] sm:$0xff]  ;;  %v2225_v39 = vld [vmem:[#allocation3 + $0xb0] sm:$0xff] }
 0x174   : > { %v1621_v22 = vadd.f32 %v2798_v15, %v1620_v51  ;;  %v3184_v23 = vpop.f32.mrb[65].mxu0  ;;  %1553 = vst.msk [vmem:[#allocation3 + $0xf8] sm:$0xff] %vm701_vm4, %v1544_v36  ;;  %v1921_v15 = vld [vmem:[#allocation3 + $0x48] sm:$0xff]  ;;  %v2223_v37 = vld [vmem:[#allocation3 + $0xa0] sm:$0xff] }
 0x175   : > { %v1623_v26 = vpop.f32.mrb[66].mxu0  ;;  %1552 = vst.msk [vmem:[#allocation3 + $0xf0] sm:$0xff] %vm701_vm4, %v1543_v44  ;;  %v1925_v51 = vld [vmem:[#allocation3 + $0x68] sm:$0xff] }
 0x176   : > { %v1626_v28 = vmul.f32 0.35355338, %v1621_v22  ;;  %v3185_v29 = vpop.f32.mrb[67].mxu0  ;;  %v2808_v26 = vld [vmem:[%s4431_s3 + $0x1] ss:$0 sm:$0xff] }
 0x178   : > { %v1627_v32 = vpack.c.bf16 %v1626_v28, %v1626_v28 }
 0x17a   : > { %3203 = vmatmul.mubr.msk.bf16.vlgmr.msra.gmra.mrb[64].mxu1 %vm701_vm4, %v1627_v32 }
 0x17b   : > { %3235 = vmatpush3.bf16.xpose.msra.mxu1 %v1845_v18  ;;  %3250 = vmatprep.mubr.msk.bf16.mxu1 %vm3580_vm2, %v3579_v45  ;;  %v2220_v18 = vld [vmem:[#allocation3 + $0x88] sm:$0xff] }
 0x17c   : > { %3236 = vmatprep.subr.bf16.mxu1 %v3579_v45 }
 0x183   : > { %3237 = vmatpush3.bf16.xpose.msra.mxu1 %v1848_v46 }
 0x184   : > { %3238 = vmatprep.subr.bf16.mxu1 %v3579_v45 }
 0x18b   : > { %3239 = vmatpush3.bf16.xpose.msra.mxu1 %v1851_v47 }
 0x18c   : > { %3240 = vmatprep.subr.bf16.mxu1 %v3579_v45 }
 0x193   : > { %3241 = vmatpush3.bf16.xpose.msra.mxu1 %v1854_v33 }
 0x194   : > { %3242 = vmatprep.subr.bf16.mxu1 %v3579_v45 }
 0x19b   : > { %3243 = vmatpush3.bf16.xpose.msra.mxu1 %v1857_v50 }
 0x19c   : > { %3244 = vmatprep.subr.bf16.mxu1 %v3579_v45 }
 0x1a3   : > { %3245 = vmatpush3.bf16.xpose.msra.mxu1 %v1860_v54 }
 0x1a4   : > { %3246 = vmatprep.subr.bf16.mxu1 %v3579_v45 }
 0x1ab   : > { %3247 = vmatpush3.bf16.xpose.msra.mxu1 %v1863_v56  ;;  %v1976_v56 = vsel %vm473_vm0, %v2813_v53, 0 }
 0x1ac   : > { %3248 = vmatprep.subr.bf16.mxu1 %v3579_v45 }
 0x1b3   : > { %3249 = vmatpush3.bf16.xpose.msra.mxu1 %v1866_v58 }
 0x1b4   : > { %3314 = vmatprep.subr.bf16.mxu1 %v3579_v45 }
 0x24d   : > { %v1698_v61 = vpop.f32.mrb[64].mxu1 }
 0x24e   : > { %v3204_v62 = vpop.f32.mrb[65].mxu1  ;;  %v1704_v63 = vsel %vm1558_vm5, %v1698_v61, -1e+30 }
 0x24f   : > { %1705 = vmax.xlane.f32.xlu0 %v1704_v63  ;;  %v1701_v0 = vpop.f32.mrb[66].mxu1  ;;  %v2022_v62 = vsel %vm473_vm0, %v1764_v57, 0 }
 0x250   : > { %v3205_v2 = vpop.f32.mrb[67].mxu1 }
 0x251   : > { %v3479_v2 = vld [vmem:[%s4430_s2 + $0x20] sm:$0xff]  }
 0x2dc   : > { %v1706_v3 = vpop.xlane.xlu0 %1705 }
 0x2dd   : > { %v1707_v4 = vsub.f32 %v1704_v63, %v1706_v3 }
 0x2df   : > { %v1708_v5 = vmul.f32 1.442695, %v1707_v4  ;;  %v3480_v4 = vld [vmem:[%s4430_s2 + $0x28] sm:$0xff]  }
 0x2e1   : > { %3483 = vpow2.f32 %v1708_v5  ;;  %v2132_v5 = vld [vmem:[#allocation2 + $0x80] sm:$0xff] }
 0x2eb   : > { %v3484_v6 = vpop.eup %3483 }
 0x2ec   : > { %1710 = vadd.xlane.f32.xlu0 %v3484_v6 }
 0x379   : > { %v1711_v7 = vpop.xlane.xlu0 %1710 }
 0x37a   : > { %3485 = vrcp.f32 %v1711_v7  ;;  %v2133_v7 = vld [vmem:[#allocation2 + $0x88] sm:$0xff] }
 0x384   : > { %v3486_v8 = vpop.eup %3485 }
 0x385   : > { %v1713_v9 = vmul.f32 %v3486_v8, %v3484_v6  ;;  %v2144_v6 = vsel %vm701_vm4, %v2132_v5, 0  ;;  %v2147_v8 = vsel %vm701_vm4, %v2133_v7, 0  ;;  %v2385_v7 = vld [vmem:[#allocation2 + $0xc0] sm:$0xff] }
 0x387   : > { %v1714_v11 = vpack.c.bf16 %v1713_v9, %v1713_v9  ;;  %v2134_v9 = vld [vmem:[#allocation2 + $0x90] sm:$0xff] }
 0x389   : > { %3223 = vmatmul.mubr.bf16.vlgmr.msra.gmra.mrb[68].mxu0 %v1714_v11  ;;  %v2135_v11 = vld [vmem:[#allocation2 + $0x98] sm:$0xff] }
 0x38a   : > { %3227 = vmatpush3.bf16.msra.mxu0 %v3477_v10  ;;  %3230 = vmatprep.mubr.msk.bf16.mxu0 %vm3580_vm2, %v3579_v45  ;;  %v2150_v10 = vsel %vm701_vm4, %v2134_v9, 0  ;;  %v2386_v9 = vld [vmem:[#allocation2 + $0xc8] sm:$0xff] }
 0x38b   : > { %3228 = vmatprep.subr.bf16.mxu0 %v3579_v45 }
 0x38e   : > { %3229 = vmatpush3.bf16.msra.mxu0 %v3478_v13  ;;  %v2153_v13 = vsel %vm701_vm4, %v2135_v11, 0  ;;  %v2387_v11 = vld [vmem:[#allocation2 + $0xd0] sm:$0xff] }
 0x38f   : > { %3254 = vmatprep.subr.bf16.mxu0 %v3579_v45 }
 0x391   : > { %3231 = vmatmul.mubr.msk.bf16.vlgmr.msra.gmra.mrb[72].mxu0 %vm1582_vm3, %v3936_v52 }
 0x392   : > { %3255 = vmatpush3.bf16.msra.mxu0 %v1920_v14  ;;  %3270 = vmatprep.mubr.msk.bf16.mxu0 %vm3580_vm2, %v3579_v45  ;;  %v2136_v14 = vld [vmem:[#allocation2 + $0xa0] sm:$0xff] }
 0x393   : > { %3256 = vmatprep.subr.bf16.mxu0 %v3579_v45 }
 0x396   : > { %3257 = vmatpush3.bf16.msra.mxu0 %v1921_v15  ;;  %v2156_v15 = vsel %vm701_vm4, %v2136_v14, 0 }
 0x397   : > { %3258 = vmatprep.subr.bf16.mxu0 %v3579_v45 }
 0x39a   : > { %3259 = vmatpush3.bf16.msra.mxu0 %v1922_v16  ;;  %v2137_v16 = vld [vmem:[#allocation2 + $0xa8] sm:$0xff] }
 0x39b   : > { %3260 = vmatprep.subr.bf16.mxu0 %v3579_v45 }
 0x39e   : > { %3261 = vmatpush3.bf16.msra.mxu0 %v1923_v17  ;;  %v2159_v17 = vsel %vm701_vm4, %v2137_v16, 0 }
 0x39f   : > { %3262 = vmatprep.subr.bf16.mxu0 %v3579_v45 }
 0x3a2   : > { %3263 = vmatpush3.bf16.msra.mxu0 %v1924_v19  ;;  %v2138_v19 = vld [vmem:[#allocation2 + $0xb0] sm:$0xff] }
 0x3a3   : > { %3264 = vmatprep.subr.bf16.mxu0 %v3579_v45 }
 0x3a6   : > { %3265 = vmatpush3.bf16.msra.mxu0 %v1925_v51  ;;  %v2162_v51 = vsel %vm701_vm4, %v2138_v19, 0 }
 0x3a7   : > { %3266 = vmatprep.subr.bf16.mxu0 %v3579_v45 }
 0x3aa   : > { %3267 = vmatpush3.bf16.msra.mxu0 %v1926_v20  ;;  %v2139_v20 = vld [vmem:[#allocation2 + $0xb8] sm:$0xff] }
 0x3ab   : > { %3268 = vmatprep.subr.bf16.mxu0 %v3579_v45 }
 0x3ae   : > { %3269 = vmatpush3.bf16.msra.mxu0 %v1927_v21  ;;  %v2165_v21 = vsel %vm701_vm4, %v2139_v20, 0 }
 0x3af   : > { %3274 = vmatprep.subr.bf16.mxu0 %v3579_v45 }
 0x45c   : > { %v4237_v22 = vpop.f32.mrb[68].mxu0 }
 0x45d   : > { %v3224_v23 = vpop.f32.mrb[69].mxu0  ;;  %v1763_v3 = vpack.c.bf16 %v4237_v22, %v4237_v22 }
 0x45e   : > { %v1760_v24 = vpop.f32.mrb[70].mxu0 }
 0x45f   : > { %v3225_v25 = vpop.f32.mrb[71].mxu0 }
 0x464   : > { %v1824_v27 = vpop.f32.mrb[72].mxu0 }
 0x465   : > { %v1825_v28 = vadd.f32 %v2808_v26, %v1824_v27  ;;  %v3232_v29 = vpop.f32.mrb[73].mxu0 }
 0x466   : > { %v1827_v1 = vpop.f32.mrb[74].mxu0 }
 0x467   : > { %v1830_v30 = vmul.f32 0.35355338, %v1825_v28  ;;  %v3233_v31 = vpop.f32.mrb[75].mxu0 }
 0x469   : > { %v1831_v32 = vpack.c.bf16 %v1830_v30, %v1830_v30  ;;  %v2821_v30 = vld [vmem:[%s4431_s3 + $0x2] ss:$0 sm:$0xff] }
 0x46b   : > { %3251 = vmatmul.mubr.msk.bf16.vlgmr.msra.gmra.mrb[68].mxu1 %vm701_vm4, %v1831_v32 }
 0x46c   : > { %3315 = vmatpush3.bf16.msra.mxu1 %v2219_v34  ;;  %3330 = vmatprep.mubr.msk.bf16.mxu1 %vm3580_vm2, %v3579_v45 }
 0x46d   : > { %3316 = vmatprep.subr.bf16.mxu1 %v3579_v45 }
 0x470   : > { %3317 = vmatpush3.bf16.msra.mxu1 %v2220_v18 }
 0x471   : > { %3318 = vmatprep.subr.bf16.mxu1 %v3579_v45 }
 0x474   : > { %3319 = vmatpush3.bf16.msra.mxu1 %v2221_v12 }
 0x475   : > { %3320 = vmatprep.subr.bf16.mxu1 %v3579_v45 }
 0x478   : > { %3321 = vmatpush3.bf16.msra.mxu1 %v2222_v35 }
 0x479   : > { %3322 = vmatprep.subr.bf16.mxu1 %v3579_v45 }
 0x47c   : > { %3323 = vmatpush3.bf16.msra.mxu1 %v2223_v37 }
 0x47d   : > { %3324 = vmatprep.subr.bf16.mxu1 %v3579_v45 }
 0x480   : > { %3325 = vmatpush3.bf16.msra.mxu1 %v2224_v38  ;;  %v2472_v38 = vld [vmem:[#allocation3 + $0xc0] sm:$0xff] }
 0x481   : > { %3326 = vmatprep.subr.bf16.mxu1 %v3579_v45 }
 0x484   : > { %3327 = vmatpush3.bf16.msra.mxu1 %v2225_v39  ;;  %v2473_v39 = vld [vmem:[#allocation3 + $0xc8] sm:$0xff] }
 0x485   : > { %3328 = vmatprep.subr.bf16.mxu1 %v3579_v45 }
 0x488   : > { %3329 = vmatpush3.bf16.msra.mxu1 %v2226_v40  ;;  %v2474_v40 = vld [vmem:[#allocation3 + $0xd0] sm:$0xff] }
 0x489   : > { %3334 = vmatprep.subr.bf16.mxu1 %v3579_v45 }
 0x53e   : > { %v1902_v41 = vpop.f32.mrb[68].mxu1 }
 0x53f   : > { %v3252_v36 = vpop.f32.mrb[69].mxu1  ;;  %v1908_v43 = vsel %vm1558_vm5, %v1902_v41, -1e+30  ;;  %v2475_v41 = vld [vmem:[#allocation3 + $0xd8] sm:$0xff] }
 0x540   : > { %1909 = vmax.xlane.f32.xlu1 %v1908_v43  ;;  %v1905_v44 = vpop.f32.mrb[70].mxu1  ;;  %v2476_v36 = vld [vmem:[#allocation3 + $0xe0] sm:$0xff] }
 0x541   : > { %v3253_v46 = vpop.f32.mrb[71].mxu1  ;;  %v2478_v44 = vld [vmem:[#allocation3 + $0xf0] sm:$0xff] }
 0x542   : > { %v2479_v46 = vld [vmem:[#allocation3 + $0xf8] sm:$0xff] }
 0x5cd   : > { %v1910_v42 = vpop.xlane.xlu1 %1909 }
 0x5ce   : > { %v1911_v47 = vsub.f32 %v1908_v43, %v1910_v42  ;;  %v2477_v43 = vld [vmem:[#allocation3 + $0xe8] sm:$0xff] }
 0x5d0   : > { %v1912_v48 = vmul.f32 1.442695, %v1911_v47 }
 0x5d2   : > { %3487 = vpow2.f32 %v1912_v48 }
 0x5dc   : > { %v3488_v33 = vpop.eup %3487 }
 0x5dd   : > { %1914 = vadd.xlane.f32.xlu1 %v3488_v33 }
 0x66a   : > { %v1915_v49 = vpop.xlane.xlu1 %1914 }
 0x66b   : > { %3489 = vrcp.f32 %v1915_v49 }
 0x675   : > { %v3490_v50 = vpop.eup %3489 }
 0x676   : > { %v1917_v54 = vmul.f32 %v3490_v50, %v3488_v33 }
 0x678   : > { %v1918_v55 = vpack.c.bf16 %v1917_v54, %v1917_v54 }
 0x67a   : > { %3271 = vmatmul.mubr.bf16.vlgmr.msra.gmra.mrb[76].mxu0 %v1918_v55 }
 0x67b   : > { %3275 = vmatpush3.bf16.msra.mxu0 %v1976_v56  ;;  %3276 = vmatprep.mubr.msk.bf16.mxu0 %vm3580_vm2, %v3579_v45 }
 0x67c   : > { %3280 = vmatprep.subr.bf16.mxu0 %v3579_v45 }
 0x74d   : > { %v1962_v58 = vpop.f32.mrb[76].mxu0 }
 0x74e   : > { %v1968_v59 = vpack.c.bf16 %v1962_v58, %v1962_v58  ;;  %v3272_v61 = vpop.f32.mrb[77].mxu0  ;;  %v2826_v58 = vld [vmem:[%s4436_s8 + $0x8] sm:$0xf] }
 0x74f   : > { %v1965_v63 = vpop.f32.mrb[78].mxu0 }
 0x750   : > { %v3273_v0 = vpop.f32.mrb[79].mxu0  ;;  %3277 = vmatmul.mubr.msk.bf16.vlgmr.msra.gmra.mrb[80].mxu0 %vm701_vm4, %v1968_v59 }
 0x751   : > { %3281 = vmatpush3.bf16.msra.mxu0 %v2022_v62  ;;  %3282 = vmatprep.mubr.msk.bf16.mxu0 %vm3580_vm2, %v3579_v45  ;;  %v2274_v62 = vsel %vm473_vm0, %v2826_v58, 0  ;;  %v3481_v0 = vld [vmem:[%s4430_s2 + $0x30] sm:$0xff]  }
 0x752   : > { %3286 = vmatprep.subr.bf16.mxu0 %v3579_v45 }
 0x758   : > { %3283 = vmatmul.mubr.msk.bf16.vlgmr.msra.gmra.mrb[84].mxu0 %vm701_vm4, %v1763_v3 }
 0x759   : > { %3287 = vmatpush3.bf16.msra.mxu0 %v3479_v2  ;;  %3290 = vmatprep.mubr.msk.bf16.mxu0 %vm3580_vm2, %v3579_v45 }
 0x75a   : > { %3288 = vmatprep.subr.bf16.mxu0 %v3579_v45 }
 0x75d   : > { %3289 = vmatpush3.bf16.msra.mxu0 %v3480_v4 }
 0x75e   : > { %3294 = vmatprep.subr.bf16.mxu0 %v3579_v45 }
 0x760   : > { %3291 = vmatmul.mubr.msk.bf16.vlgmr.msra.gmra.mrb[88].mxu0 %vm1582_vm3, %v3936_v52 }
 0x761   : > { %3310 = vmatprep.mubr.msk.bf16.mxu0 %vm3580_vm2, %v3579_v45 }
 0x766   : > { %3295 = vmatpush3.bf16.xpose.msra.mxu0 %v2144_v6  ;;  %v3482_v6 = vld [vmem:[%s4430_s2 + $0x38] sm:$0xff]  }
 0x767   : > { %3296 = vmatprep.subr.bf16.mxu0 %v3579_v45 }
 0x76e   : > { %3297 = vmatpush3.bf16.xpose.msra.mxu0 %v2147_v8  ;;  %v2397_v8 = vsel %vm701_vm4, %v2385_v7, 0 }
 0x76f   : > { %3298 = vmatprep.subr.bf16.mxu0 %v3579_v45 }
 0x776   : > { %3299 = vmatpush3.bf16.xpose.msra.mxu0 %v2150_v10  ;;  %v2400_v10 = vsel %vm701_vm4, %v2386_v9, 0 }
 0x777   : > { %3300 = vmatprep.subr.bf16.mxu0 %v3579_v45 }
 0x77e   : > { %3301 = vmatpush3.bf16.xpose.msra.mxu0 %v2153_v13  ;;  %v2403_v13 = vsel %vm701_vm4, %v2387_v11, 0 }
 0x77f   : > { %3302 = vmatprep.subr.bf16.mxu0 %v3579_v45 }
 0x786   : > { %3303 = vmatpush3.bf16.xpose.msra.mxu0 %v2156_v15  ;;  %v2389_v15 = vld [vmem:[#allocation2 + $0xe0] sm:$0xff] }
 0x787   : > { %3304 = vmatprep.subr.bf16.mxu0 %v3579_v45  ;;  %v2409_v16 = vsel %vm701_vm4, %v2389_v15, 0 }
 0x78e   : > { %3305 = vmatpush3.bf16.xpose.msra.mxu0 %v2159_v17  ;;  %v2390_v17 = vld [vmem:[#allocation2 + $0xe8] sm:$0xff] }
 0x78f   : > { %3306 = vmatprep.subr.bf16.mxu0 %v3579_v45  ;;  %v2412_v19 = vsel %vm701_vm4, %v2390_v17, 0 }
 0x796   : > { %3307 = vmatpush3.bf16.xpose.msra.mxu0 %v2162_v51  ;;  %v2391_v51 = vld [vmem:[#allocation2 + $0xf0] sm:$0xff] }
 0x797   : > { %3308 = vmatprep.subr.bf16.mxu0 %v3579_v45  ;;  %v2415_v20 = vsel %vm701_vm4, %v2391_v51, 0 }
 0x79e   : > { %3309 = vmatpush3.bf16.xpose.msra.mxu0 %v2165_v21  ;;  %v2392_v21 = vld [vmem:[#allocation2 + $0xf8] sm:$0xff] }
 0x79f   : > { %3368 = vmatprep.subr.bf16.mxu0 %v3579_v45 }
 0x823   : > { %v2012_v22 = vpop.f32.mrb[80].mxu0 }
 0x824   : > { %v3278_v23 = vpop.f32.mrb[81].mxu0 }
 0x825   : > { %v2015_v24 = vpop.f32.mrb[82].mxu0 }
 0x826   : > { %v3279_v25 = vpop.f32.mrb[83].mxu0 }
 0x82b   : > { %v2058_v26 = vpop.f32.mrb[84].mxu0 }
 0x82c   : > { %v4303_v27 = vadd.f32 %v2058_v26, %v2012_v22  ;;  %v3284_v28 = vpop.f32.mrb[85].mxu0  ;;  %v2418_v22 = vsel %vm701_vm4, %v2392_v21, 0 }
 0x82d   : > { %v2061_v29 = vpop.f32.mrb[86].mxu0 }
 0x82e   : > { %v3285_v1 = vpop.f32.mrb[87].mxu0  ;;  %v2833_v29 = vld [vmem:[%s4431_s3 + $0x3] ss:$0 sm:$0xff] }
 0x833   : > { %v2123_v31 = vpop.f32.mrb[88].mxu0 }
 0x834   : > { %v2124_v32 = vadd.f32 %v2821_v30, %v2123_v31  ;;  %v3292_v34 = vpop.f32.mrb[89].mxu0 }
 0x835   : > { %v2126_v18 = vpop.f32.mrb[90].mxu0 }
 0x836   : > { %v2129_v12 = vmul.f32 0.35355338, %v2124_v32  ;;  %v3293_v35 = vpop.f32.mrb[91].mxu0 }
 0x838   : > { %v2130_v37 = vpack.c.bf16 %v2129_v12, %v2129_v12 }
 0x83a   : > { %3311 = vmatmul.mubr.msk.bf16.vlgmr.msra.gmra.mrb[92].mxu0 %vm701_vm4, %v2130_v37 }
 0x83b   : > { %3369 = vmatpush3.bf16.msra.mxu0 %v2472_v38  ;;  %3384 = vmatprep.mubr.msk.bf16.mxu0 %vm3580_vm2, %v3579_v45 }
 0x83c   : > { %3370 = vmatprep.subr.bf16.mxu0 %v3579_v45 }
 0x83f   : > { %3371 = vmatpush3.bf16.msra.mxu0 %v2473_v39 }
 0x840   : > { %3372 = vmatprep.subr.bf16.mxu0 %v3579_v45 }
 0x843   : > { %3373 = vmatpush3.bf16.msra.mxu0 %v2474_v40 }
 0x844   : > { %3374 = vmatprep.subr.bf16.mxu0 %v3579_v45 }
 0x847   : > { %3375 = vmatpush3.bf16.msra.mxu0 %v2475_v41 }
 0x848   : > { %3376 = vmatprep.subr.bf16.mxu0 %v3579_v45 }
 0x84b   : > { %3377 = vmatpush3.bf16.msra.mxu0 %v2476_v36 }
 0x84c   : > { %3378 = vmatprep.subr.bf16.mxu0 %v3579_v45 }
 0x84f   : > { %3379 = vmatpush3.bf16.msra.mxu0 %v2477_v43 }
 0x850   : > { %3380 = vmatprep.subr.bf16.mxu0 %v3579_v45 }
 0x853   : > { %3381 = vmatpush3.bf16.msra.mxu0 %v2478_v44 }
 0x854   : > { %3382 = vmatprep.subr.bf16.mxu0 %v3579_v45 }
 0x857   : > { %3383 = vmatpush3.bf16.msra.mxu0 %v2479_v46 }
 0x858   : > { %3388 = vmatprep.subr.bf16.mxu0 %v3579_v45 }
 0x90d   : > { %v2201_v42 = vpop.f32.mrb[92].mxu0 }
 0x90e   : > { %v3312_v47 = vpop.f32.mrb[93].mxu0  ;;  %v2207_v48 = vsel %vm1558_vm5, %v2201_v42, -1e+30  ;;  %v2838_v42 = vld [vmem:[%s4436_s8 + $0xc] sm:$0xf] }
 0x90f   : > { %2208 = vmax.xlane.f32.xlu0 %v2207_v48  ;;  %v2204_v33 = vpop.f32.mrb[94].mxu0 }
 0x910   : > { %v3313_v49 = vpop.f32.mrb[95].mxu0 }
 0x99c   : > { %v2209_v50 = vpop.xlane.xlu0 %2208 }
 0x99d   : > { %v2210_v53 = vsub.f32 %v2207_v48, %v2209_v50  ;;  %v2527_v48 = vsel %vm473_vm0, %v2838_v42, 0 }
 0x99f   : > { %v2211_v54 = vmul.f32 1.442695, %v2210_v53 }
 0x9a1   : > { %3491 = vpow2.f32 %v2211_v54 }
 0x9ab   : > { %v3492_v55 = vpop.eup %3491 }
 0x9ac   : > { %2213 = vadd.xlane.f32.xlu1 %v3492_v55 }
 0xa39   : > { %v2214_v56 = vpop.xlane.xlu1 %2213 }
 0xa3a   : > { %3493 = vrcp.f32 %v2214_v56  ;;  %v2840_v56 = vld [vmem:[%s4437_s9] ss:$0 sm:$0xff] }
 0xa44   : > { %v3494_v57 = vpop.eup %3493 }
 0xa45   : > { %v2216_v59 = vmul.f32 %v3494_v57, %v3492_v55 }
 0xa47   : > { %v2217_v61 = vpack.c.bf16 %v2216_v59, %v2216_v59 }
 0xa49   : > { %3331 = vmatmul.mubr.bf16.vlgmr.msra.gmra.mrb[72].mxu1 %v2217_v61 }
 0xa4a   : > { %3335 = vmatpush3.bf16.msra.mxu1 %v2274_v62  ;;  %3336 = vmatprep.mubr.msk.bf16.mxu1 %vm3580_vm2, %v3579_v45 }
 0xa4b   : > { %3340 = vmatprep.subr.bf16.mxu1 %v3579_v45 }
 0xb1c   : > { %v2261_v63 = vpop.f32.mrb[72].mxu1 }
 0xb1d   : > { %v2267_v2 = vpack.c.bf16 %v2261_v63, %v2261_v63  ;;  %v3332_v3 = vpop.f32.mrb[73].mxu1 }
 0xb1e   : > { %v2264_v4 = vpop.f32.mrb[74].mxu1 }
 0xb1f   : > { %v3333_v5 = vpop.f32.mrb[75].mxu1  ;;  %3337 = vmatmul.mubr.msk.bf16.vlgmr.msra.gmra.mrb[76].mxu1 %vm701_vm4, %v2267_v2 }
 0xb20   : > { %3341 = vmatpush3.bf16.msra.mxu1 %v3481_v0  ;;  %3344 = vmatprep.mubr.msk.bf16.mxu1 %vm3580_vm2, %v3579_v45 }
 0xb21   : > { %3342 = vmatprep.subr.bf16.mxu1 %v3579_v45 }
 0xb24   : > { %3343 = vmatpush3.bf16.msra.mxu1 %v3482_v6 }
 0xb25   : > { %3348 = vmatprep.subr.bf16.mxu1 %v3579_v45 }
 0xb27   : > { %3345 = vmatmul.mubr.msk.bf16.vlgmr.msra.gmra.mrb[80].mxu1 %vm1582_vm3, %v3936_v52  ;;  %v2388_v52 = vld [vmem:[#allocation2 + $0xd8] sm:$0xff] }
 0xb28   : > { %3364 = vmatprep.mubr.msk.bf16.mxu1 %vm3580_vm2, %v3579_v45  ;;  %v2406_v14 = vsel %vm701_vm4, %v2388_v52, 0 }
 0xb2d   : > { %3349 = vmatpush3.bf16.xpose.msra.mxu1 %v2397_v8 }
 0xb2e   : > { %3350 = vmatprep.subr.bf16.mxu1 %v3579_v45 }
 0xb35   : > { %3351 = vmatpush3.bf16.xpose.msra.mxu1 %v2400_v10 }
 0xb36   : > { %3352 = vmatprep.subr.bf16.mxu1 %v3579_v45 }
 0xb3d   : > { %3353 = vmatpush3.bf16.xpose.msra.mxu1 %v2403_v13 }
 0xb3e   : > { %3354 = vmatprep.subr.bf16.mxu1 %v3579_v45 }
 0xb45   : > { %3355 = vmatpush3.bf16.xpose.msra.mxu1 %v2406_v14 }
 0xb46   : > { %3356 = vmatprep.subr.bf16.mxu1 %v3579_v45 }
 0xb4d   : > { %3357 = vmatpush3.bf16.xpose.msra.mxu1 %v2409_v16 }
 0xb4e   : > { %3358 = vmatprep.subr.bf16.mxu1 %v3579_v45 }
 0xb55   : > { %3359 = vmatpush3.bf16.xpose.msra.mxu1 %v2412_v19 }
 0xb56   : > { %3360 = vmatprep.subr.bf16.mxu1 %v3579_v45 }
 0xb5d   : > { %3361 = vmatpush3.bf16.xpose.msra.mxu1 %v2415_v20 }
 0xb5e   : > { %3362 = vmatprep.subr.bf16.mxu1 %v3579_v45 }
 0xb65   : > { %3363 = vmatpush3.bf16.xpose.msra.mxu1 %v2418_v22 }
 0xbf2   : > { %v2310_v23 = vpop.f32.mrb[76].mxu1 }
 0xbf3   : > { %v2316_v24 = vadd.f32 %v2310_v23, %v4303_v27  ;;  %v3338_v25 = vpop.f32.mrb[77].mxu1 }
 0xbf4   : > { %v2313_v26 = vpop.f32.mrb[78].mxu1 }
 0xbf5   : > { %v3339_v28 = vpop.f32.mrb[79].mxu1 }
 0xbfa   : > { %v2376_v1 = vpop.f32.mrb[80].mxu1 }
 0xbfb   : > { %v2377_v30 = vadd.f32 %v2833_v29, %v2376_v1  ;;  %v3346_v31 = vpop.f32.mrb[81].mxu1 }
 0xbfc   : > { %v2379_v32 = vpop.f32.mrb[82].mxu1 }
 0xbfd   : > { %v2382_v34 = vmul.f32 0.35355338, %v2377_v30  ;;  %v3347_v18 = vpop.f32.mrb[83].mxu1 }
 0xbff   : > { %v2383_v12 = vpack.c.bf16 %v2382_v34, %v2382_v34 }
 0xc01   : > { %3365 = vmatmul.mubr.msk.bf16.vlgmr.msra.gmra.mrb[84].mxu1 %vm701_vm4, %v2383_v12 }
 0xcd4   : > { %v2454_v35 = vpop.f32.mrb[84].mxu1 }
 0xcd5   : > { %v3366_v37 = vpop.f32.mrb[85].mxu1  ;;  %v2460_v27 = vsel %vm1558_vm5, %v2454_v35, -1e+30 }
 0xcd6   : > { %2461 = vmax.xlane.f32.xlu0 %v2460_v27  ;;  %v2457_v38 = vpop.f32.mrb[86].mxu1 }
 0xcd7   : > { %v3367_v39 = vpop.f32.mrb[87].mxu1 }
 0xd63   : > { %v2462_v40 = vpop.xlane.xlu0 %2461 }
 0xd64   : > { %v2463_v41 = vsub.f32 %v2460_v27, %v2462_v40 }
 0xd66   : > { %v2464_v36 = vmul.f32 1.442695, %v2463_v41 }
 0xd68   : > { %3495 = vpow2.f32 %v2464_v36 }
 0xd72   : > { %v3496_v43 = vpop.eup %3495 }
 0xd73   : > { %2466 = vadd.xlane.f32.xlu1 %v3496_v43 }
 0xe00   : > { %v2467_v44 = vpop.xlane.xlu1 %2466 }
 0xe01   : > { %3497 = vrcp.f32 %v2467_v44 }
 0xe0b   : > { %v3498_v46 = vpop.eup %3497 }
 0xe0c   : > { %v2469_v47 = vmul.f32 %v3498_v46, %v3496_v43 }
 0xe0e   : > { %v2470_v60 = vpack.c.bf16 %v2469_v47, %v2469_v47 }
 0xe10   : > { %3385 = vmatmul.mubr.bf16.vlgmr.msra.gmra.mrb[96].mxu0 %v2470_v60 }
 0xe11   : > { %3389 = vmatpush3.bf16.msra.mxu0 %v2527_v48  ;;  %3390 = vmatprep.mubr.msk.bf16.mxu0 %vm3580_vm2, %v3579_v45 }
 0xee3   : > { %v2514_v33 = vpop.f32.mrb[96].mxu0 }
 0xee4   : > { %v2520_v49 = vpack.c.bf16 %v2514_v33, %v2514_v33  ;;  %v3386_v50 = vpop.f32.mrb[97].mxu0 }
 0xee5   : > { %v2517_v53 = vpop.f32.mrb[98].mxu0 }
 0xee6   : > { %v3387_v54 = vpop.f32.mrb[99].mxu0  ;;  %3391 = vmatmul.mubr.msk.bf16.vlgmr.msra.gmra.mrb[100].mxu0 %vm701_vm4, %v2520_v49 }
 0xfb9   : > { %v2563_v55 = vpop.f32.mrb[100].mxu0 }
 0xfba   : > { %v2569_v57 = vadd.f32 %v2563_v55, %v2316_v24  ;;  %v3392_v45 = vpop.f32.mrb[101].mxu0 }
 0xfbb   : > { %v2566_v58 = vpop.f32.mrb[102].mxu0 }
 0xfbc   : > { %v2577_v59 = vadd.f32 %v2840_v56, %v2569_v57  ;;  %v3393_v61 = vpop.f32.mrb[103].mxu0 }
 0xfbe   : > { %2578 = vst.msk [vmem:[%s387_s24] sm:$0xff] %vm1582_vm3, %v2577_v59 }
 0xfbf   : > { %3512 = shalt.err (!%p3509_p5)
}
 0xfc0   : > { %s3513_s30 = scalar_lea.hbm %s4380_s29, 128  ;;  %s3517_s27 = scalar_lea.hbm %s4438_s10, 256 }
 0xfc1   : > { %p3514_p6 = scmp.ne.s32.totalorder %s4380_s29, %s3513_s30  ;;  %p3518_p10 = scmp.lt.u32.totalorder %s4380_s29, %s4438_s10 }
 0xfc2   : > { %p3519_p11 = scmp.lt.u32.totalorder %s3517_s27, %s3513_s30  ;;  %p3521_p13 = scmp.lt.u32.totalorder %s3513_s30, %s4380_s29 }
 0xfc3   : > { %p3515_p7 = pnand %p3514_p6, %p3677_p4 }
 0xfc4   : > { %p3520_p12 = por %p3519_p11, %p3518_p10 }
 0xfc5   : > { %p3516_p9 = pneg %p3515_p7 }
 0xfc6   : > { %p3522_p0 = por %p3521_p13, %p3520_p12 }
 0xfc8   : > { %p3523_p1 = pnand %p3522_p0, %p3516_p9 }
 0xfca   : > { %3526 = shalt.err (!%p3523_p1)
}
 0xfcb   : > { %3402 = dma.vmem_to_hbm [thread:$0]  (%p3677_p4), %s4382_s11, 128, %s4380_s29, %s2580_s16  }
 0xfcc PF: > { %p3408_p2 = scmp.ge.s32.totalorder %s3577_s18, 2  ;;  %s2606_s0 = sand.u32 1, %s3557_s13  }
 0xfcd   : > { %s2607_s12 = scalar_lea.sflag [#allocation5], %s2606_s0 }
 0xfce   : > { %p3405_p3 = pnand %p3408_p2, %p3684_p8 }
 0xfd0   : > { %3552 = dma.done.wait (!%p3405_p3), %s2607_s12, 128  }
 0xfd1   : > { %3554 = vsyncadd (!%p3405_p3), %s2607_s12, 4294967168  ;;  %s23_s18 = sadd.s32 1, %s3577_s18   ;;  %s4443_s13 = smov %s3561_s14 }
 0xfd2   : > { %p20_p5 = scmp.ge.s32.totalorder %s23_s18, 4   ;;  %s4444_s14 = smov %s3565_s15 }
 0xfd3   : > { %s4445_s15 = smov %s3690_s26  ;;  %s4446_s16 = smov %s3573_s17 }
 0xfd4   : > { %s4447_s17 = smov %s4449_s21  ;;  %22 = sbr.rel (!%p20_p5) target bundleno = 6 (0x6), region = 135 }
 0xfdb   :  { %2612 = vsyncpa [#allocation5], 1 }
 0xfdc   :  { %2614 = vsyncpa [#allocation5 + $0x1], 1 }

</bundles_post_ra>
